<compile_context>
chip_gen: v7x
topology: tpu7x:2x2x1
jax: 0.10.0
libtpu: 0.0.40
codegen_flags: <defaults>
</compile_context>

<pallas_src>
import jax
import jax.numpy as jnp
from jax.experimental import pallas as pl
from jax.experimental.pallas import tpu as pltpu

_NEG_LARGE = jnp.float32(-1e30)   # additive mask for invalid (filter, time) positions


def _round_up(n, m):
    return ((n + m - 1) // m) * m


def _choose_batch_tile(batch, t_pad, d, elem_bytes, x_tile_budget_bytes=4 << 20):
    """Largest multiple-of-8 batch tile whose double-buffered x tile fits the budget
    (budget chosen so it fits comfortably even in v7x's 64 MiB VMEM)."""
    rows = x_tile_budget_bytes // max(1, 2 * t_pad * d * elem_bytes)
    rows = max(8, (rows // 8) * 8)
    return int(min(rows, _round_up(batch, 8)))


def _cnn_kernel(x_ref, wconv_ref, bconv_ref, mask_ref, wlin_ref, blin_ref, out_ref):
    """One batch tile: fused conv (sum of shifted matmuls over all filters at once)
    + ReLU + masked global max-pool + linear + log_softmax."""
    kmax = wconv_ref.shape[0]
    t_out = mask_ref.shape[0]
    tb = x_ref.shape[0]
    hc = wconv_ref.shape[2]

    acc = jnp.zeros((tb, t_out, hc), jnp.float32)
    for dk in range(kmax):                         # static unroll, kmax is tiny
        xs = x_ref[:, dk:dk + t_out, :]            # [TB, t_out, D] bf16, static slice
        acc = acc + jax.lax.dot_general(
            xs, wconv_ref[dk],                     # [D, HC_pad] bf16, VMEM-resident
            dimension_numbers=(((2,), (0,)), ((), ())),
            preferred_element_type=jnp.float32)    # f32 accumulation on the MXU

    acc = acc + bconv_ref[...]                     # f32 bias, broadcast over (TB, t_out)
    acc = jnp.maximum(acc, 0.0)                    # ReLU (f32, VPU)
    acc = acc + mask_ref[...]                      # -1e30 at invalid time steps / filter
    pooled = jnp.max(acc, axis=1)                  # global max-pool over time -> [TB, HC]

    logits = jnp.dot(pooled.astype(wlin_ref.dtype), wlin_ref[...],
                     preferred_element_type=jnp.float32)
    logits = logits + blin_ref[...]                # [TB, O], f32

    m = jnp.max(logits, axis=-1, keepdims=True)    # numerically stable log_softmax
    z = logits - m
    lse = jnp.log(jnp.sum(jnp.exp(z), axis=-1, keepdims=True))
    out_ref[...] = (z - lse).astype(out_ref.dtype)


def cnn_forward(x, conv_ws, conv_bs, lin_w, lin_b, kernel_size_list,
                hid_dim, output_dim, *, batch_tile=None,
                compute_dtype=jnp.bfloat16, lane_pad=128):
    """x: [B, T, D] float32; conv_ws[i]: [k_i, D, H]; conv_bs[i]: [1, H];
    lin_w: [NF*H, O]; lin_b: [1, O].  Returns log-probs [B, O] (float32)."""
    B, T, D = x.shape
    ks = tuple(int(k) for k in kernel_size_list)
    nf = len(ks)
    kmax, kmin = max(ks), min(ks)
    assert T >= kmax, "sequence shorter than the largest conv kernel"
    H = hid_dim
    hc = nf * H
    hc_pad = _round_up(hc, lane_pad)     # lane-dense matmul N dim / stores
    t_out = T - kmin + 1                 # time positions of the widest conv output
    t_pad = T + (kmax - kmin)            # pad T so every shift dk stays in-bounds

    # ---- fuse all filters into one conv weight [kmax, D, HC_pad] (+ bias [1, HC_pad])
    w_big = jnp.zeros((kmax, D, hc_pad), jnp.float32)
    b_big = jnp.zeros((1, hc_pad), jnp.float32)
    mask = jnp.zeros((t_out, hc_pad), jnp.float32)
    for i, k in enumerate(ks):
        w_big = w_big.at[:k, :, i * H:(i + 1) * H].set(conv_ws[i])
        b_big = b_big.at[:, i * H:(i + 1) * H].set(conv_bs[i])
        valid = T - k + 1                # filter i only has `valid` output positions
        if valid < t_out:
            mask = mask.at[valid:, i * H:(i + 1) * H].set(_NEG_LARGE)
    w_lin = jnp.zeros((hc_pad, output_dim), jnp.float32).at[:hc, :].set(lin_w)

    elem_bytes = jnp.dtype(compute_dtype).itemsize
    tb = batch_tile if batch_tile is not None else _choose_batch_tile(
        B, t_pad, D, elem_bytes)
    tb = max(8, (tb // 8) * 8)           # sublane-aligned output block
    b_pad = _round_up(B, tb)

    x_p = jnp.zeros((b_pad, t_pad, D), compute_dtype).at[:B, :T, :].set(
        x.astype(compute_dtype))
    w_big = w_big.astype(compute_dtype)
    w_lin = w_lin.astype(compute_dtype)
    lin_b32 = lin_b.astype(jnp.float32)

    grid = (b_pad // tb,)
    out = pl.pallas_call(
        _cnn_kernel,
        out_shape=jax.ShapeDtypeStruct((b_pad, output_dim), jnp.float32),
        grid=grid,
        in_specs=[
            pl.BlockSpec((tb, t_pad, D), lambda i: (i, 0, 0)),        # x: streamed
            pl.BlockSpec((kmax, D, hc_pad), lambda i: (0, 0, 0)),     # conv W: resident
            pl.BlockSpec((1, hc_pad), lambda i: (0, 0)),              # conv b: resident
            pl.BlockSpec((t_out, hc_pad), lambda i: (0, 0)),          # mask: resident
            pl.BlockSpec((hc_pad, output_dim), lambda i: (0, 0)),     # lin W: resident
            pl.BlockSpec((1, output_dim), lambda i: (0, 0)),          # lin b: resident
        ],
        out_specs=pl.BlockSpec((tb, output_dim), lambda i: (i, 0)),
        compiler_params=pltpu.CompilerParams(
            dimension_semantics=("parallel",)),   # v7x: 2 TCs split the batch grid
    )(x_p, w_big, b_big, mask, w_lin, lin_b32)
    return out[:B]


def reference_forward(x, conv_ws, conv_bs, lin_w, lin_b, kernel_size_list,
                      matmul_dtype=jnp.float32):
    """Pure-JAX reference mirroring the PyTorch forward.  With matmul_dtype=bfloat16
    it mirrors the kernel's MXU numerics (bf16 operands, f32 accumulate, f32 VPU)."""
    B, T, D = x.shape
    xm = x.astype(matmul_dtype)
    pooled_parts = []
    for idx, k in enumerate(kernel_size_list):
        w = conv_ws[idx].astype(matmul_dtype)          # [k, D, H]
        b = conv_bs[idx].astype(jnp.float32)           # [1, H]
        t_out = T - k + 1
        conv = jnp.zeros((B, t_out, w.shape[-1]), jnp.float32)
        for dk in range(k):
            conv = conv + jnp.einsum('btd,dh->bth', xm[:, dk:dk + t_out, :], w[dk],
                                     preferred_element_type=jnp.float32)
        conv = jax.nn.relu(conv + b[None])
        pooled_parts.append(jnp.max(conv, axis=1))
    cat = jnp.concatenate(pooled_parts, axis=1)        # [B, NF*H]
    logits = jnp.dot(cat.astype(matmul_dtype), lin_w.astype(matmul_dtype),
                     preferred_element_type=jnp.float32) + lin_b
    return jax.nn.log_softmax(logits, axis=-1)


if __name__ == "__main__":
    # Small shapes consistent with the module's forward: x is [B, T, D].
    B, T, D = 16, 8, 32
    hid_dim = 16
    kernel_size_list = [2, 3, 4]
    num_filters = len(kernel_size_list)
    output_dim = 4

    key = jax.random.PRNGKey(0)
    keys = jax.random.split(key, 2 * num_filters + 3)

    x = jax.random.normal(keys[0], (B, T, D), dtype=jnp.float32)

    conv_ws = []
    conv_bs = []
    for i, k in enumerate(kernel_size_list):
        # PyTorch Conv2d weight [H, 1, k, D] -> stored here as [k, D, H]
        conv_ws.append(0.1 * jax.random.normal(keys[1 + i], (k, D, hid_dim),
                                               dtype=jnp.float32))
        conv_bs.append(0.1 * jax.random.normal(keys[1 + num_filters + i],
                                               (1, hid_dim), dtype=jnp.float32))

    # PyTorch Linear weight [O, NF*H] -> stored transposed as [NF*H, O]
    lin_w = 0.1 * jax.random.normal(keys[-2], (num_filters * hid_dim, output_dim),
                                    dtype=jnp.float32)
    lin_b = 0.1 * jax.random.normal(keys[-1], (1, output_dim), dtype=jnp.float32)

    out = cnn_forward(x, conv_ws, conv_bs, lin_w, lin_b, kernel_size_list,
                      hid_dim, output_dim, batch_tile=8)   # grid of 2 batch tiles
    out = jax.block_until_ready(out)
    assert out.shape == (B, output_dim)
    assert bool(jnp.all(jnp.isfinite(out)))

    # Tight check against a reference that mirrors the kernel's bf16-MXU numerics.
    ref_bf16 = reference_forward(x, conv_ws, conv_bs, lin_w, lin_b, kernel_size_list,
                                 matmul_dtype=jnp.bfloat16)
    assert jnp.allclose(out, ref_bf16, atol=1e-3, rtol=1e-3), "mismatch vs bf16 reference"

    # Looser check against the full-f32 reference (bf16 MXU operands dominate the diff).
    ref_f32 = reference_forward(x, conv_ws, conv_bs, lin_w, lin_b, kernel_size_list)
    assert jnp.allclose(out, ref_f32, atol=3e-2, rtol=3e-2), "mismatch vs f32 reference"

    print("KERNEL_OK")
</pallas_src>

<mosaic_0001>
module attributes {stable_mosaic.version = 11 : i64} {
  func.func @_cnn_kernel(%arg0: i32, %arg1: memref<8x10x32xbf16, #tpu.memory_space<vmem>>, %arg2: memref<4x32x128xbf16, #tpu.memory_space<vmem>>, %arg3: memref<1x128xf32, #tpu.memory_space<vmem>>, %arg4: memref<7x128xf32, #tpu.memory_space<vmem>>, %arg5: memref<128x4xbf16, #tpu.memory_space<vmem>>, %arg6: memref<1x4xf32, #tpu.memory_space<vmem>>, %arg7: memref<8x4xf32, #tpu.memory_space<vmem>>) attributes {dimension_semantics = [#tpu.dimension_semantics<parallel>], iteration_bounds = array<i64: 2>, scalar_prefetch = 0 : i64, scratch_operands = 0 : i64, tpu.core_type = #tpu.core_type<tc>, window_params = [{transform_indices = @transform_0, window_bounds = array<i64: 8, 10, 32>}, {pipeline_mode = #tpu.pipeline_mode<synchronous>, transform_indices = @transform_1, window_bounds = array<i64: 4, 32, 128>}, {pipeline_mode = #tpu.pipeline_mode<synchronous>, transform_indices = @transform_2, window_bounds = array<i64: 1, 128>}, {pipeline_mode = #tpu.pipeline_mode<synchronous>, transform_indices = @transform_3, window_bounds = array<i64: 7, 128>}, {pipeline_mode = #tpu.pipeline_mode<synchronous>, transform_indices = @transform_4, window_bounds = array<i64: 128, 4>}, {pipeline_mode = #tpu.pipeline_mode<synchronous>, transform_indices = @transform_5, window_bounds = array<i64: 1, 4>}, {transform_indices = @transform_6, window_bounds = array<i64: 8, 4>}]} {
    %cst = arith.constant 0.000000e+00 : f32
    %0 = vector.broadcast %cst : f32 to vector<8x7x128xf32>
    %c0 = arith.constant 0 : index
    %c0_0 = arith.constant 0 : index
    %c0_1 = arith.constant 0 : index
    %1 = vector.load %arg1[%c0, %c0_0, %c0_1] : memref<8x10x32xbf16, #tpu.memory_space<vmem>>, vector<8x7x32xbf16>
    %c0_2 = arith.constant 0 : index
    %c0_3 = arith.constant 0 : index
    %c0_4 = arith.constant 0 : index
    %2 = vector.load %arg2[%c0_2, %c0_3, %c0_4] : memref<4x32x128xbf16, #tpu.memory_space<vmem>>, vector<1x32x128xbf16>
    %3 = vector.shape_cast %2 : vector<1x32x128xbf16> to vector<32x128xbf16>
    %cst_5 = arith.constant dense<0.000000e+00> : vector<8x7x128xf32>
    %4 = tpu.matmul %1, %3, %cst_5 {dimension_numbers = #tpu.dot_dimension_numbers<[2], [0], [0, 1], [1], [0, 0, 0, 1, 1, 1], [], []>} : vector<8x7x32xbf16>, vector<32x128xbf16>, vector<8x7x128xf32> -> vector<8x7x128xf32>
    %5 = arith.addf %0, %4 : vector<8x7x128xf32>
    %c0_6 = arith.constant 0 : index
    %c1 = arith.constant 1 : index
    %c0_7 = arith.constant 0 : index
    %6 = vector.load %arg1[%c0_6, %c1, %c0_7] : memref<8x10x32xbf16, #tpu.memory_space<vmem>>, vector<8x7x32xbf16>
    %c1_8 = arith.constant 1 : index
    %c0_9 = arith.constant 0 : index
    %c0_10 = arith.constant 0 : index
    %7 = vector.load %arg2[%c1_8, %c0_9, %c0_10] : memref<4x32x128xbf16, #tpu.memory_space<vmem>>, vector<1x32x128xbf16>
    %8 = vector.shape_cast %7 : vector<1x32x128xbf16> to vector<32x128xbf16>
    %cst_11 = arith.constant dense<0.000000e+00> : vector<8x7x128xf32>
    %9 = tpu.matmul %6, %8, %cst_11 {dimension_numbers = #tpu.dot_dimension_numbers<[2], [0], [0, 1], [1], [0, 0, 0, 1, 1, 1], [], []>} : vector<8x7x32xbf16>, vector<32x128xbf16>, vector<8x7x128xf32> -> vector<8x7x128xf32>
    %10 = arith.addf %5, %9 : vector<8x7x128xf32>
    %c0_12 = arith.constant 0 : index
    %c2 = arith.constant 2 : index
    %c0_13 = arith.constant 0 : index
    %11 = vector.load %arg1[%c0_12, %c2, %c0_13] : memref<8x10x32xbf16, #tpu.memory_space<vmem>>, vector<8x7x32xbf16>
    %c2_14 = arith.constant 2 : index
    %c0_15 = arith.constant 0 : index
    %c0_16 = arith.constant 0 : index
    %12 = vector.load %arg2[%c2_14, %c0_15, %c0_16] : memref<4x32x128xbf16, #tpu.memory_space<vmem>>, vector<1x32x128xbf16>
    %13 = vector.shape_cast %12 : vector<1x32x128xbf16> to vector<32x128xbf16>
    %cst_17 = arith.constant dense<0.000000e+00> : vector<8x7x128xf32>
    %14 = tpu.matmul %11, %13, %cst_17 {dimension_numbers = #tpu.dot_dimension_numbers<[2], [0], [0, 1], [1], [0, 0, 0, 1, 1, 1], [], []>} : vector<8x7x32xbf16>, vector<32x128xbf16>, vector<8x7x128xf32> -> vector<8x7x128xf32>
    %15 = arith.addf %10, %14 : vector<8x7x128xf32>
    %c0_18 = arith.constant 0 : index
    %c3 = arith.constant 3 : index
    %c0_19 = arith.constant 0 : index
    %16 = vector.load %arg1[%c0_18, %c3, %c0_19] : memref<8x10x32xbf16, #tpu.memory_space<vmem>>, vector<8x7x32xbf16>
    %c3_20 = arith.constant 3 : index
    %c0_21 = arith.constant 0 : index
    %c0_22 = arith.constant 0 : index
    %17 = vector.load %arg2[%c3_20, %c0_21, %c0_22] : memref<4x32x128xbf16, #tpu.memory_space<vmem>>, vector<1x32x128xbf16>
    %18 = vector.shape_cast %17 : vector<1x32x128xbf16> to vector<32x128xbf16>
    %cst_23 = arith.constant dense<0.000000e+00> : vector<8x7x128xf32>
    %19 = tpu.matmul %16, %18, %cst_23 {dimension_numbers = #tpu.dot_dimension_numbers<[2], [0], [0, 1], [1], [0, 0, 0, 1, 1, 1], [], []>} : vector<8x7x32xbf16>, vector<32x128xbf16>, vector<8x7x128xf32> -> vector<8x7x128xf32>
    %20 = arith.addf %15, %19 : vector<8x7x128xf32>
    %c0_24 = arith.constant 0 : index
    %c0_25 = arith.constant 0 : index
    %21 = vector.load %arg3[%c0_24, %c0_25] : memref<1x128xf32, #tpu.memory_space<vmem>>, vector<1x128xf32>
    %22 = vector.shape_cast %21 : vector<1x128xf32> to vector<1x1x128xf32>
    %23 = vector.broadcast %22 : vector<1x1x128xf32> to vector<8x7x128xf32>
    %24 = arith.addf %20, %23 : vector<8x7x128xf32>
    %cst_26 = arith.constant 0.000000e+00 : f32
    %25 = vector.broadcast %cst_26 : f32 to vector<8x7x128xf32>
    %26 = arith.maximumf %24, %25 : vector<8x7x128xf32>
    %c0_27 = arith.constant 0 : index
    %c0_28 = arith.constant 0 : index
    %27 = vector.load %arg4[%c0_27, %c0_28] : memref<7x128xf32, #tpu.memory_space<vmem>>, vector<7x128xf32>
    %28 = vector.shape_cast %27 : vector<7x128xf32> to vector<1x7x128xf32>
    %29 = vector.broadcast %28 : vector<1x7x128xf32> to vector<8x7x128xf32>
    %30 = arith.addf %26, %29 : vector<8x7x128xf32>
    %cst_29 = arith.constant dense<0xFF800000> : vector<8x128xf32>
    %31 = vector.multi_reduction <maximumf>, %30, %cst_29 [1] : vector<8x7x128xf32> to vector<8x128xf32>
    %32 = arith.truncf %31 : vector<8x128xf32> to vector<8x128xbf16>
    %c0_30 = arith.constant 0 : index
    %c0_31 = arith.constant 0 : index
    %33 = vector.load %arg5[%c0_30, %c0_31] : memref<128x4xbf16, #tpu.memory_space<vmem>>, vector<128x4xbf16>
    %cst_32 = arith.constant dense<0.000000e+00> : vector<8x4xf32>
    %34 = tpu.matmul %32, %33, %cst_32 {dimension_numbers = #tpu.dot_dimension_numbers<[1], [0], [0], [1], [0, 0, 1, 1], [], []>} : vector<8x128xbf16>, vector<128x4xbf16>, vector<8x4xf32> -> vector<8x4xf32>
    %c0_33 = arith.constant 0 : index
    %c0_34 = arith.constant 0 : index
    %35 = vector.load %arg6[%c0_33, %c0_34] : memref<1x4xf32, #tpu.memory_space<vmem>>, vector<1x4xf32>
    %36 = vector.broadcast %35 : vector<1x4xf32> to vector<8x4xf32>
    %37 = arith.addf %34, %36 : vector<8x4xf32>
    %cst_35 = arith.constant dense<0xFF800000> : vector<8xf32>
    %38 = vector.multi_reduction <maximumf>, %37, %cst_35 [1] : vector<8x4xf32> to vector<8xf32>
    %39 = vector.shape_cast %38 : vector<8xf32> to vector<8x1xf32>
    %40 = vector.broadcast %39 : vector<8x1xf32> to vector<8x4xf32>
    %41 = arith.subf %37, %40 : vector<8x4xf32>
    %42 = math.exp %41 : vector<8x4xf32>
    %cst_36 = arith.constant dense<0.000000e+00> : vector<8xf32>
    %43 = vector.multi_reduction <add>, %42, %cst_36 [1] : vector<8x4xf32> to vector<8xf32>
    %44 = vector.shape_cast %43 : vector<8xf32> to vector<8x1xf32>
    %45 = math.log %44 : vector<8x1xf32>
    %46 = vector.broadcast %45 : vector<8x1xf32> to vector<8x4xf32>
    %47 = arith.subf %41, %46 : vector<8x4xf32>
    %c0_37 = arith.constant 0 : index
    %c0_38 = arith.constant 0 : index
    %48 = vector.load %arg7[%c0_37, %c0_38] : memref<8x4xf32, #tpu.memory_space<vmem>>, vector<8x4xf32>
    tpu.vector_store %arg7[%c0_37, %c0_38], %47 {strides = array<i32>} : memref<8x4xf32, #tpu.memory_space<vmem>>, vector<8x4xf32>,
    return
  }
  func.func @transform_0(%arg0: i32) -> (i32, i32, i32) {
    %c0_i32 = arith.constant 0 : i32
    %c0_i32_0 = arith.constant 0 : i32
    %c0_i32_1 = arith.constant 0 : i32
    return %arg0, %c0_i32, %c0_i32_0 : i32, i32, i32
  }
  func.func @transform_1(%arg0: i32) -> (i32, i32, i32) {
    %c0_i32 = arith.constant 0 : i32
    %c0_i32_0 = arith.constant 0 : i32
    %c0_i32_1 = arith.constant 0 : i32
    %c0_i32_2 = arith.constant 0 : i32
    return %c0_i32, %c0_i32_0, %c0_i32_1 : i32, i32, i32
  }
  func.func @transform_2(%arg0: i32) -> (i32, i32) {
    %c0_i32 = arith.constant 0 : i32
    %c0_i32_0 = arith.constant 0 : i32
    %c0_i32_1 = arith.constant 0 : i32
    return %c0_i32, %c0_i32_0 : i32, i32
  }
  func.func @transform_3(%arg0: i32) -> (i32, i32) {
    %c0_i32 = arith.constant 0 : i32
    %c0_i32_0 = arith.constant 0 : i32
    %c0_i32_1 = arith.constant 0 : i32
    return %c0_i32, %c0_i32_0 : i32, i32
  }
  func.func @transform_4(%arg0: i32) -> (i32, i32) {
    %c0_i32 = arith.constant 0 : i32
    %c0_i32_0 = arith.constant 0 : i32
    %c0_i32_1 = arith.constant 0 : i32
    return %c0_i32, %c0_i32_0 : i32, i32
  }
  func.func @transform_5(%arg0: i32) -> (i32, i32) {
    %c0_i32 = arith.constant 0 : i32
    %c0_i32_0 = arith.constant 0 : i32
    %c0_i32_1 = arith.constant 0 : i32
    return %c0_i32, %c0_i32_0 : i32, i32
  }
  func.func @transform_6(%arg0: i32) -> (i32, i32) {
    %c0_i32 = arith.constant 0 : i32
    %c0_i32_0 = arith.constant 0 : i32
    return %arg0, %c0_i32 : i32, i32
  }
}

</mosaic_0001>

<bundles_post_ra>
// kernel: tpu_custom_call.1
= control target key start
LH: loop header
LB: loop body
LE: loop exit
PB: predicated region body
PF: predicated region fallthrough
CT: control target
= control target key end

     0   :  { %s5165_s21 = smov 0   ;;  %s6477_s0 = inlined_call_operand.vmem [shape: bf16[16,10,32], index: 0, kind: input, shape index: {}]   ;;  %s6478_s1 = inlined_call_operand.vmem [shape: bf16[4,32,128], index: 1, kind: input, shape index: {}]   ;;  %s6479_s2 = inlined_call_operand.vmem [shape: f32[1,128], index: 2, kind: input, shape index: {}]   ;;  %s6480_s3 = inlined_call_operand.vmem [shape: f32[7,128], index: 3, kind: input, shape index: {}]   ;;  %s6481_s4 = inlined_call_operand.vmem [shape: bf16[128,4], index: 4, kind: input, shape index: {}]   ;;  %s6482_s5 = inlined_call_operand.vmem [shape: f32[1,4], index: 5, kind: input, shape index: {}]   ;;  %s6483_s6 = inlined_call_operand.vmem [shape: f32[16,4], index: 6, kind: output, shape index: {}]  }
   0x1 LB: > { %s5171_s22 = sadd.s32 4294967295, %s5125_s21   ;;  %p4823_p0 = scmp.ge.s32.totalorder %s5125_s21, 1  ;;  %s5125_s21 = sphi %s5165_s21, %s16_s21  }
   0x2   : > { %p214_p1 = scmp.lt.s32.totalorder %s5125_s21, 3 }
   0x4   : > { %p215_p2 = pnand %p4823_p0, %p214_p1 }
   0x6   : > { %218 = sbr.rel (%p215_p2) target bundleno = 1024 (0x400), region = 44 }
   0xd   : > { %v5098_v0 = vld [vmem:[%s6478_s1 + $0x10] sm:$0xff]   ;;  %s4824_s25 = sshll.u32 %s5171_s22, 3  ;;  %v5099_v1 = vld [vmem:[%s6478_s1] sm:$0xff]   ;;  %v292_v2 = vlaneseq  ;;  %v5100_v3 = vld [vmem:[%s6478_s1 + $0x18] sm:$0xff]   ;;  %v5127_v6 = vmov 1966171168  }
   0xe   : > { %p245_p3 = scmp.lt.s32.totalorder %s4824_s25, 15  ;;  %5012 = vmatprep.subr.bf16.mxu1 %v5098_v0  ;;  %5024 = vmatprep.subr.bf16.mxu0 %v5099_v1  ;;  %v5101_v4 = vld [vmem:[%s6478_s1 + $0x8] sm:$0xff]   ;;  %v5191_v5 = vld [vmem:[%s6478_s1 + $0x20] sm:$0xff]   ;;  %v290_v7 = vunpack.c.l.s4 %v5127_v6  ;;  %vm740_vm0 = vcmask 261120   ;;  %vm4544_vm1 = vcmask 1046528   ;;  %vm5129_vm2 = vmmov 0  }
   0xf   : > { %5013 = vmatpush3.bf16.msra.mxu1 %v5098_v0  ;;  %5025 = vmatpush3.bf16.msra.mxu0 %v5099_v1  ;;  %v293_v8 = vshrl.u32 %v292_v2, 7  ;;  %vm4648_vm3 = vcmask 1041409   ;;  %vm4650_vm4 = vcmask 1042434   ;;  %vm4652_vm5 = vcmask 1043459   ;;  %p251_p4 = scmp.lt.s32.totalorder %s5171_s22, 1 }
  0x10   : > { %s6596_s25 = smov (!%p245_p3, %s4824_s25), 15  ;;  %5014 = vmatprep.subr.bf16.mxu1 %v5100_v3  ;;  %5026 = vmatprep.subr.bf16.mxu0 %v5101_v4  ;;  %v291_v10 = vunpack.c.0.s8 %v290_v7  ;;  %vm4654_vm6 = vcmask 1044484   ;;  %vm4656_vm7 = vcmask 1045509   ;;  %vm4658_vm8 = vcmask 1046534  }
  0x11   : > { %s4978_s10 = sshll.u32 %s6596_s25, 3  ;;  %vm4660_vm9 = vcmask 1047559   ;;  %vm4752_vm10 = vcmask 31744   ;;  %s6598_s22 = smov (!%p251_p4, %s5171_s22), 1 }
  0x12   : > { %s5196_s13 = scalar_lea.vmem %s6477_s0, %s4978_s10  ;;  %v5202_v14 = vsub.s32 %v291_v10, %v293_v8  ;;  %s4827_s20 = sshll.u32 %s6598_s22, 3 }
  0x13   : > { %5015 = vmatpush3.bf16.msra.mxu1 %v5100_v3  ;;  %v4832_v9 = vld.sshfl [vmem:[%s5196_s13] sm:$0x33 pattern:$0x75316420]  ;;  %5027 = vmatpush3.bf16.msra.mxu0 %v5101_v4  ;;  %s254_s25 = scalar_lea.vmem %s6483_s6, %s4827_s20 }
  0x14   : > { %v4833_v11 = vld.sshfl [vmem:[%s5196_s13 + $0x8] sm:$0x33 pattern:$0x75316420]  ;;  %v288_v12 = vcombine.high %v4832_v9, %v4832_v9  ;;  %5036 = vmatprep.subr.bf16.mxu1 %v5191_v5  ;;  %v295_v18 = vrot.slane %v4832_v9, %v5202_v14 }
  0x15   : > { %v4834_v13 = vld.sshfl [vmem:[%s5196_s13 + $0x10] sm:$0x33 pattern:$0x75316420]  ;;  %v312_v15 = vcombine.high %v4833_v11, %v4833_v11  ;;  %v319_v20 = vrot.slane %v4833_v11, %v5202_v14 }
  0x16   : > { %v336_v16 = vcombine.high %v4834_v13, %v4834_v13  ;;  %v4835_v17 = vld.sshfl [vmem:[%s5196_s13 + $0x18] sm:$0x33 pattern:$0x75316420]  ;;  %v302_v19 = vrot.slane %v288_v12, %v5202_v14  ;;  %v343_v22 = vrot.slane %v4834_v13, %v5202_v14  ;;  %v303_v26 = vcombine.high %v295_v18, %v295_v18 }
  0x17   : > { %v326_v21 = vrot.slane %v312_v15, %v5202_v14  ;;  %v360_v24 = vcombine.high %v4835_v17, %v4835_v17  ;;  %v5214_v25 = vrot.slane %v4835_v17, %v5202_v14  ;;  %v327_v28 = vcombine.high %v319_v20, %v319_v20  ;;  %v4836_v57 = vld.sshfl [vmem:[%s5196_s13 + $0x20] sm:$0x33 pattern:$0x75316420] }
  0x18   : > { %v5211_v23 = vrot.slane %v336_v16, %v5202_v14  ;;  %v304_v27 = vcombine.high %v302_v19, %v302_v19  ;;  %v473_v30 = vunpack.i.h.s16 %v295_v18  ;;  %v475_v31 = vunpack.i.h.s16 %v302_v19 }
  0x19   : > { %v328_v29 = vcombine.high %v326_v21, %v326_v21  ;;  %v480_v32 = vunpack.i.h.s16 %v319_v20  ;;  %v487_v33 = vunpack.i.h.s16 %v343_v22  ;;  %v477_v34 = vunpack.i.h.s16 %v303_v26 }
  0x1a   : > { %v479_v35 = vunpack.i.h.s16 %v304_v27  ;;  %v559_v36 = vcombine.low %v326_v21, %v327_v28  ;;  %v482_v37 = vunpack.i.h.s16 %v326_v21  ;;  %v4840_v38 = vpack.i.b16 %v302_v19, %v473_v30 }
  0x1b   : > { %v4841_v39 = vpack.i.b16 %v303_v26, %v475_v31  ;;  %v4843_v40 = vpack.i.b16 %v5211_v23, %v487_v33  ;;  %v484_v41 = vunpack.i.h.s16 %v327_v28  ;;  %v4842_v42 = vpack.i.b16 %v304_v27, %v477_v34 }
  0x1c   : > { %v532_v43 = vpack.i.b16 %v480_v32, %v479_v35  ;;  %v581_v44 = vrot.slane %v559_v36, %v5202_v14  ;;  %v4860_v45 = vpack.i.b16 %v319_v20, %v304_v27  ;;  %v4861_v48 = vpack.i.b16 %v326_v21, %v480_v32 }
  0x1d   : > { %v557_v46 = vcombine.low %v4840_v38, %v4841_v39  ;;  %v560_v47 = vcombine.low %v328_v29, %v4843_v40  ;;  %v4862_v49 = vpack.i.b16 %v327_v28, %v482_v37  ;;  %v4863_v51 = vpack.i.b16 %v328_v29, %v484_v41 }
  0x1e   : > { %v558_v50 = vcombine.low %v4842_v42, %v532_v43  ;;  %v853_v52 = vcombine.low %v295_v18, %v302_v19  ;;  %v854_v53 = vcombine.low %v303_v26, %v4860_v45  ;;  %v351_v58 = vcombine.high %v343_v22, %v343_v22  ;;  %v4837_v43 = vld.sshfl [vmem:[%s5196_s13 + $0x28] sm:$0x33 pattern:$0x75316420] }
  0x1f   : > { %v567_v54 = vrot.slane %v557_v46, %v5202_v14  ;;  %v588_v55 = vrot.slane %v560_v47, %v5202_v14  ;;  %v855_v56 = vcombine.low %v4861_v48, %v4862_v49  ;;  %v856_v60 = vcombine.low %v4863_v51, %v343_v22 }
  0x20   : > { %v574_v59 = vrot.slane %v558_v50, %v5202_v14  ;;  %v863_v61 = vrot.slane %v853_v52, %v5202_v14  ;;  %v870_v62 = vrot.slane %v854_v53, %v5202_v14  ;;  %v352_v1 = vcombine.high %v5211_v23, %v5211_v23  ;;  %v4838_v52 = vld.sshfl [vmem:[%s5196_s13 + $0x30] sm:$0x33 pattern:$0x75316420] }
  0x21   : > { %v590_v63 = vcombine.low %v581_v44, %v588_v55  ;;  %v877_v0 = vrot.slane %v855_v56, %v5202_v14  ;;  %v374_v2 = vrot.slane %v360_v24, %v5202_v14  ;;  %v884_v4 = vrot.slane %v856_v60, %v5202_v14 }
  0x22   : > { %v589_v3 = vcombine.low %v567_v54, %v574_v59  ;;  %v885_v6 = vcombine.low %v863_v61, %v870_v62  ;;  %v384_v7 = vcombine.high %v4836_v57, %v4836_v57  ;;  %v391_v9 = vrot.slane %v4836_v57, %v5202_v14 }
  0x23   : > { %v604_v8 = vrot.slane %v590_v63, %v5202_v14  ;;  %v489_v10 = vunpack.i.h.s16 %v5211_v23  ;;  %v491_v11 = vunpack.i.h.s16 %v351_v58  ;;  %v886_v13 = vcombine.low %v877_v0, %v884_v4 }
  0x24   : > { %v597_v12 = vrot.slane %v589_v3, %v5202_v14  ;;  %v893_v15 = vrot.slane %v885_v6, %v5202_v14  ;;  %v398_v16 = vrot.slane %v384_v7, %v5202_v14  ;;  %v5235_v17 = vcombine.high %v391_v9, %v391_v9 }
  0x25   : > { %v493_v18 = vunpack.i.h.s16 %v352_v1  ;;  %v494_v19 = vunpack.i.h.s16 %v5214_v25  ;;  %v501_v20 = vunpack.i.h.s16 %v391_v9  ;;  %v900_v22 = vrot.slane %v886_v13, %v5202_v14 }
  0x26   : > { %v605_v21 = vcombine.low %v597_v12, %v604_v8  ;;  %v503_v24 = vunpack.i.h.s16 %v398_v16  ;;  %v4844_v26 = vpack.i.b16 %v351_v58, %v489_v10  ;;  %v4845_v27 = vpack.i.b16 %v352_v1, %v491_v11  ;;  %v5103_v12 = vld [vmem:[%s6478_s1 + $0x28] sm:$0xff]  }
  0x27   : > { %v539_v28 = vpack.i.b16 %v494_v19, %v493_v18  ;;  %v4846_v29 = vpack.i.b16 %v398_v16, %v501_v20  ;;  %v4852_v30 = vcombine.high %v5214_v25, %v374_v2  ;;  %v901_v31 = vcombine.low %v893_v15, %v900_v22 }
  0x28   : > { %5016 = vmatprep.mubr.msk.bf16.mxu1 %vm740_vm0, %v605_v21  ;;  %v4847_v32 = vpack.i.b16 %v5235_v17, %v503_v24  ;;  %v375_v33 = vcombine.high %v5214_v25, %v5214_v25  ;;  %v376_v34 = vcombine.high %v374_v2, %v374_v2  ;;  %v606_v35 = vcombine.low %v4844_v26, %v4845_v27 }
  0x29   : > { %v607_v36 = vcombine.low %v539_v28, %v374_v2  ;;  %v630_v37 = vrot.slane %v4852_v30, %v5202_v14  ;;  %v496_v38 = vunpack.i.h.s16 %v374_v2  ;;  %5028 = vmatprep.mubr.msk.bf16.mxu0 %vm740_vm0, %v901_v31  ;;  %v4864_v41 = vpack.i.b16 %v5214_v25, %v352_v1 }
  0x2a   : > { %v609_v39 = vcombine.low %v4846_v29, %v4847_v32  ;;  %v498_v40 = vunpack.i.h.s16 %v375_v33  ;;  %v4865_v42 = vpack.i.b16 %v374_v2, %v494_v19  ;;  %v616_v44 = vrot.slane %v606_v35, %v5202_v14 }
  0x2b   : > { %v623_v45 = vrot.slane %v607_v36, %v5202_v14  ;;  %v4866_v46 = vpack.i.b16 %v375_v33, %v496_v38  ;;  %v902_v47 = vcombine.low %v5211_v23, %v351_v58  ;;  %v905_v51 = vcombine.low %v391_v9, %v398_v16  ;;  %v5277_v33 = vld [vmem:[%s6478_s1 + $0x30] sm:$0xff]  }
  0x2c   : > { %v637_v48 = vrot.slane %v609_v39, %v5202_v14  ;;  %v4867_v49 = vpack.i.b16 %v376_v34, %v498_v40  ;;  %v903_v50 = vcombine.low %v4864_v41, %v4865_v42  ;;  %v400_v55 = vcombine.high %v398_v16, %v398_v16 }
  0x2d   : > { %v638_v53 = vcombine.low %v616_v44, %v623_v45  ;;  %v912_v54 = vrot.slane %v902_v47, %v5202_v14  ;;  %v408_v25 = vcombine.high %v4837_v43, %v4837_v43  ;;  %v933_v60 = vrot.slane %v905_v51, %v5202_v14 }
  0x2e   : > { %v639_v56 = vcombine.low %v630_v37, %v637_v48  ;;  %v904_v57 = vcombine.low %v4866_v46, %v4867_v49  ;;  %v919_v59 = vrot.slane %v903_v50, %v5202_v14  ;;  %v415_v23 = vrot.slane %v4837_v43, %v5202_v14  ;;  %v4839_v37 = vld.sshfl [vmem:[%s5196_s13 + $0x38] sm:$0x33 pattern:$0x75316420] }
  0x2f   : > { %v646_v61 = vrot.slane %v638_v53, %v5202_v14  ;;  %v422_v58 = vrot.slane %v408_v25, %v5202_v14  ;;  %v432_v62 = vcombine.high %v4838_v52, %v4838_v52  ;;  %v439_v2 = vrot.slane %v4838_v52, %v5202_v14 }
  0x30   : > { %v653_v63 = vrot.slane %v639_v56, %v5202_v14  ;;  %v926_v0 = vrot.slane %v904_v57, %v5202_v14  ;;  %v934_v1 = vcombine.low %v912_v54, %v919_v59  ;;  %v423_v3 = vcombine.high %v415_v23, %v415_v23 }
  0x31   : > { %v424_v4 = vcombine.high %v422_v58, %v422_v58  ;;  %v446_v6 = vrot.slane %v432_v62, %v5202_v14  ;;  %v505_v7 = vunpack.i.h.s16 %v5235_v17  ;;  %v447_v11 = vcombine.high %v439_v2, %v439_v2 }
  0x32   : > { %v654_v8 = vcombine.low %v646_v61, %v653_v63  ;;  %v935_v9 = vcombine.low %v926_v0, %v933_v60  ;;  %v942_v10 = vrot.slane %v934_v1, %v5202_v14  ;;  %v507_v15 = vunpack.i.h.s16 %v400_v55  ;;  %v4886_v63 = vld.sshfl [vmem:[%s5196_s13] sm:$0x32 pattern:$0x75316420] }
  0x33   : > { %v5268_v13 = vcombine.high %v446_v6, %v446_v6  ;;  %v508_v16 = vunpack.i.h.s16 %v415_v23  ;;  %v515_v18 = vunpack.i.h.s16 %v439_v2  ;;  %v517_v20 = vunpack.i.h.s16 %v446_v6 }
  0x34   : > { %5017 = vmatmul.mubr.msk.bf16.vlgmr.msra.gmra.mrb[0].mxu1 %vm740_vm0, %v654_v8  ;;  %v949_v19 = vrot.slane %v935_v9, %v5202_v14  ;;  %v519_v21 = vunpack.i.h.s16 %v447_v11  ;;  %v4848_v22 = vpack.i.b16 %v400_v55, %v505_v7  ;;  %v656_v27 = vcombine.low %v422_v58, %v423_v3 }
  0x35   : > { %5037 = vmatpush3.bf16.msra.mxu1 %v5191_v5  ;;  %v546_v24 = vpack.i.b16 %v508_v16, %v507_v15  ;;  %v4849_v26 = vpack.i.b16 %v446_v6, %v515_v18  ;;  %v510_v28 = vunpack.i.h.s16 %v422_v58  ;;  %v4850_v30 = vpack.i.b16 %v447_v11, %v517_v20  ;;  %v4889_v20 = vld.sshfl [vmem:[%s5196_s13 + $0xc] sm:$0x1 pattern:$0x75316420] }
  0x36   : > { %v950_v29 = vcombine.low %v942_v10, %v949_v19  ;;  %v4851_v31 = vpack.i.b16 %v5268_v13, %v519_v21  ;;  %v512_v32 = vunpack.i.h.s16 %v423_v3  ;;  %5038 = vmatprep.subr.bf16.mxu1 %v5103_v12  ;;  %v672_v36 = vrot.slane %v656_v27, %v5202_v14  ;;  %v4888_v10 = vld.sshfl [vmem:[%s5196_s13 + $0x8] sm:$0x32 pattern:$0x75316420] }
  0x37   : > { %v655_v34 = vcombine.low %v4848_v22, %v546_v24  ;;  %v657_v35 = vcombine.low %v424_v4, %v4849_v26  ;;  %v4868_v5 = vpack.i.b16 %v415_v23, %v400_v55  ;;  %v4869_v39 = vpack.i.b16 %v422_v58, %v508_v16  ;;  %v4890_v27 = vld.sshfl [vmem:[%s5196_s13 + $0x10] sm:$0x32 pattern:$0x75316420] }
  0x38   : > { %5029 = vmatmul.mubr.msk.bf16.vlgmr.msra.gmra.mrb[0].mxu0 %vm740_vm0, %v950_v29  ;;  %v658_v38 = vcombine.low %v4850_v30, %v4851_v31  ;;  %v4870_v40 = vpack.i.b16 %v423_v3, %v510_v28  ;;  %v4871_v41 = vpack.i.b16 %v424_v4, %v512_v32  ;;  %v954_v45 = vcombine.low %v446_v6, %v447_v11  ;;  %v4887_v4 = vld.sshfl [vmem:[%s5196_s13 + $0x4] sm:$0x1 pattern:$0x75316420] }
  0x39   : > { %v665_v42 = vrot.slane %v655_v34, %v5202_v14  ;;  %v679_v43 = vrot.slane %v657_v35, %v5202_v14  ;;  %v951_v44 = vcombine.low %v5235_v17, %v4868_v5  ;;  %5039 = vmatpush3.bf16.msra.mxu1 %v5103_v12  ;;  %v456_v49 = vcombine.high %v4839_v37, %v4839_v37 }
  0x3a   : > { %v686_v46 = vrot.slane %v658_v38, %v5202_v14  ;;  %v952_v47 = vcombine.low %v4869_v39, %v4870_v40  ;;  %v953_v48 = vcombine.low %v4871_v41, %v439_v2  ;;  %5048 = vmatprep.subr.bf16.mxu1 %v5277_v33  ;;  %v982_v52 = vrot.slane %v954_v45, %v5202_v14  ;;  %v4891_v41 = vld.sshfl [vmem:[%s5196_s13 + $0x14] sm:$0x1 pattern:$0x75316420] }
  0x3b   : > { %v687_v50 = vcombine.low %v665_v42, %v672_v36  ;;  %v961_v51 = vrot.slane %v951_v44, %v5202_v14  ;;  %v463_v53 = vrot.slane %v4839_v37, %v5202_v14  ;;  %v470_v25 = vrot.slane %v456_v49, %v5202_v14 }
  0x3c   : > { %v688_v54 = vcombine.low %v679_v43, %v686_v46  ;;  %v968_v17 = vrot.slane %v952_v47, %v5202_v14  ;;  %v975_v55 = vrot.slane %v953_v48, %v5202_v14  ;;  %v521_v57 = vunpack.i.h.s16 %v5268_v13 }
  0x3d   : > { %v695_v56 = vrot.slane %v687_v50, %v5202_v14  ;;  %v522_v59 = vunpack.i.h.s16 %v463_v53  ;;  %v471_v60 = vcombine.high %v463_v53, %v463_v53  ;;  %v4853_v62 = vcombine.high %v463_v53, %v470_v25  ;;  %v4892_v50 = vld.sshfl [vmem:[%s5196_s13 + $0x18] sm:$0x32 pattern:$0x75316420] }
  0x3e   : > { %v702_v61 = vrot.slane %v688_v54, %v5202_v14  ;;  %v983_v23 = vcombine.low %v961_v51, %v968_v17  ;;  %v984_v58 = vcombine.low %v975_v55, %v982_v52  ;;  %v472_v1 = vcombine.high %v470_v25, %v470_v25  ;;  %v4893_v54 = vld.sshfl [vmem:[%s5196_s13 + $0x1c] sm:$0x1 pattern:$0x75316420] }
  0x3f   : > { %v553_v0 = vpack.i.b16 %v522_v59, %v521_v57  ;;  %v524_v2 = vunpack.i.h.s16 %v470_v25  ;;  %v526_v3 = vunpack.i.h.s16 %v471_v60  ;;  %v719_v9 = vrot.slane %v4853_v62, %v5202_v14  ;;  %v4895_v62 = vld.sshfl [vmem:[%s5196_s13 + $0x24] sm:$0x1 pattern:$0x75316420] }
  0x40   : > { %v703_v6 = vcombine.low %v695_v56, %v702_v61  ;;  %v991_v7 = vrot.slane %v983_v23, %v5202_v14  ;;  %v998_v8 = vrot.slane %v984_v58, %v5202_v14  ;;  %v4872_v12 = vpack.i.b16 %v463_v53, %v5268_v13 }
  0x41   : > { %v704_v11 = vcombine.low %v553_v0, %v470_v25  ;;  %v4873_v15 = vpack.i.b16 %v470_v25, %v522_v59  ;;  %v4874_v16 = vpack.i.b16 %v471_v60, %v524_v2  ;;  %v4875_v19 = vpack.i.b16 %v472_v1, %v526_v3  ;;  %v4894_v59 = vld.sshfl [vmem:[%s5196_s13 + $0x20] sm:$0x32 pattern:$0x75316420] }
  0x42   : > { %5020 = vmatprep.mubr.msk.bf16.mxu1 %vm740_vm0, %v703_v6  ;;  %v999_v18 = vcombine.low %v991_v7, %v998_v8  ;;  %v1562_v21 = vcombine.high %v4886_v63, %v4886_v63  ;;  %v1569_v22 = vrot.slane %v4886_v63, %v5202_v14  ;;  %v5309_v28 = vrot.slane %v4887_v4, %v5202_v14 }
  0x43   : > { %v712_v24 = vrot.slane %v704_v11, %v5202_v14  ;;  %v1000_v26 = vcombine.low %v4872_v12, %v4873_v15  ;;  %v1600_v29 = vcombine.high %v4888_v10, %v4888_v10  ;;  %v1001_v13 = vcombine.low %v4874_v16, %v4875_v19  ;;  %v4896_v19 = vld.sshfl [vmem:[%s5196_s13 + $0x28] sm:$0x32 pattern:$0x75316420] }
  0x44   : > { %5032 = vmatprep.mubr.msk.bf16.mxu0 %vm740_vm0, %v999_v18  ;;  %v5313_v30 = vrot.slane %v1562_v21, %v5202_v14  ;;  %v5315_v31 = vcombine.high %v1569_v22, %v1569_v22  ;;  %v5318_v32 = vrot.slane %v4888_v10, %v5202_v14  ;;  %v5325_v5 = vrot.slane %v4889_v20, %v5202_v14 }
  0x45   : > { %v720_v34 = vcombine.low %v712_v24, %v719_v9  ;;  %v1008_v35 = vrot.slane %v1000_v26, %v5202_v14  ;;  %v5322_v36 = vrot.slane %v1600_v29, %v5202_v14  ;;  %v1015_v37 = vrot.slane %v1001_v13, %v5202_v14  ;;  %v4897_v26 = vld.sshfl [vmem:[%s5196_s13 + $0x2c] sm:$0x1 pattern:$0x75316420] }
  0x46   : > { %v5330_v38 = vcombine.high %v5313_v30, %v5313_v30  ;;  %v1615_v39 = vcombine.high %v5318_v32, %v5318_v32  ;;  %v1638_v40 = vcombine.high %v4890_v27, %v4890_v27  ;;  %v5339_v44 = vrot.slane %v4890_v27, %v5202_v14 }
  0x47   : > { %v727_v42 = vrot.slane %v720_v34, %v5202_v14  ;;  %v1616_v43 = vcombine.high %v5322_v36, %v5322_v36  ;;  %v1867_v45 = vunpack.i.h.s16 %v5322_v36  ;;  %v1016_v46 = vcombine.low %v1008_v35, %v1015_v37  ;;  %v4898_v34 = vld.sshfl [vmem:[%s5196_s13 + $0x30] sm:$0x32 pattern:$0x75316420] }
  0x48   : > { %v5343_v47 = vrot.slane %v1638_v40, %v5202_v14  ;;  %v1869_v48 = vunpack.i.h.s16 %v1615_v39  ;;  %v4902_v49 = vpack.i.b16 %v5322_v36, %v5309_v28  ;;  %v1943_v53 = vcombine.low %v5313_v30, %v5315_v31 }
  0x49   : > { %5021 = vmatmul.mubr.msk.bf16.gmra.mrb[4].mxu1 %vm740_vm0, %v727_v42  ;;  %v1871_v51 = vunpack.i.h.s16 %v1616_v43  ;;  %v4903_v52 = vpack.i.b16 %v1615_v39, %v1867_v45  ;;  %v5355_v17 = vrot.slane %v4891_v41, %v5202_v14  ;;  %v1023_v55 = vrot.slane %v1016_v46, %v5202_v14 }
  0x4a   : > { %v4904_v25 = vpack.i.b16 %v1616_v43, %v1869_v48  ;;  %v1944_v56 = vcombine.low %v5330_v38, %v4902_v49  ;;  %v4918_v57 = vcombine.high %v5339_v44, %v5343_v47  ;;  %v1953_v61 = vrot.slane %v1943_v53, %v5202_v14  ;;  %v4899_v53 = vld.sshfl [vmem:[%s5196_s13 + $0x34] sm:$0x1 pattern:$0x75316420] }
  0x4b   : > { %v4905_v60 = vpack.i.b16 %v5325_v5, %v1871_v51  ;;  %v1676_v23 = vcombine.high %v4892_v50, %v4892_v50  ;;  %v1683_v58 = vrot.slane %v4892_v50, %v5202_v14  ;;  %5033 = vmatmul.mubr.msk.bf16.gmra.mrb[4].mxu0 %vm740_vm0, %v1023_v55  ;;  %v5370_v2 = vrot.slane %v4893_v54, %v5202_v14 }
  0x4c   : > { %v1945_v63 = vcombine.low %v4903_v52, %v4904_v25  ;;  %v1960_v0 = vrot.slane %v1944_v56, %v5202_v14  ;;  %v2002_v1 = vrot.slane %v4918_v57, %v5202_v14  ;;  %v1714_v7 = vcombine.high %v4894_v59, %v4894_v59 }
  0x4d   : > { %v1946_v3 = vcombine.low %v4905_v60, %v5343_v47  ;;  %v5374_v4 = vrot.slane %v1676_v23, %v5202_v14  ;;  %v5376_v6 = vcombine.high %v1683_v58, %v1683_v58  ;;  %v1721_v10 = vrot.slane %v4894_v59, %v5202_v14  ;;  %v4900_v23 = vld.sshfl [vmem:[%s5196_s13 + $0x38] sm:$0x32 pattern:$0x75316420] }
  0x4e   : > { %v1967_v8 = vrot.slane %v1945_v63, %v5202_v14  ;;  %v1975_v9 = vcombine.low %v1953_v61, %v1960_v0  ;;  %v5381_v11 = vrot.slane %v4895_v62, %v5202_v14  ;;  %v5389_v16 = vrot.slane %v1714_v7, %v5202_v14 }
  0x4f   : > { %v1974_v12 = vrot.slane %v1946_v3, %v5202_v14  ;;  %v5386_v15 = vcombine.high %v5374_v4, %v5374_v4  ;;  %v1881_v18 = vunpack.i.h.s16 %v5374_v4  ;;  %v5394_v21 = vcombine.high %v1721_v10, %v1721_v10  ;;  %v4901_v10 = vld.sshfl [vmem:[%s5196_s13 + $0x3c] sm:$0x1 pattern:$0x75316420] }
  0x50   : > { %v1983_v20 = vrot.slane %v1975_v9, %v5202_v14  ;;  %v1883_v22 = vunpack.i.h.s16 %v5376_v6  ;;  %v4906_v24 = vpack.i.b16 %v5374_v4, %v5355_v17  ;;  %v5407_v35 = vcombine.high %v5389_v16, %v5389_v16 }
  0x51   : > { %v1976_v27 = vcombine.low %v1967_v8, %v1974_v12  ;;  %v1885_v29 = vunpack.i.h.s16 %v5386_v15  ;;  %v4907_v13 = vpack.i.b16 %v5376_v6, %v1881_v18  ;;  %v1995_v39 = vcombine.low %v5389_v16, %v5394_v21 }
  0x52   : > { %v4908_v37 = vpack.i.b16 %v5386_v15, %v1883_v22  ;;  %v1752_v40 = vcombine.high %v4896_v19, %v4896_v19  ;;  %v5413_v41 = vrot.slane %v4896_v19, %v5202_v14  ;;  %v5418_v48 = vrot.slane %v4897_v26, %v5202_v14 }
  0x53   : > { %v1990_v42 = vrot.slane %v1976_v27, %v5202_v14  ;;  %v4909_v43 = vpack.i.b16 %v5370_v2, %v1885_v29  ;;  %v1993_v46 = vcombine.low %v4906_v24, %v4907_v13  ;;  %v2023_v49 = vrot.slane %v1995_v39, %v5202_v14 }
  0x54   : > { %v5422_v50 = vrot.slane %v1752_v40, %v5202_v14  ;;  %v1767_v51 = vcombine.high %v5413_v41, %v5413_v41  ;;  %v1790_v52 = vcombine.high %v4898_v34, %v4898_v34  ;;  %v5429_v56 = vrot.slane %v4898_v34, %v5202_v14 }
  0x55   : > { %v1991_v54 = vcombine.low %v1983_v20, %v1990_v42  ;;  %v1994_v55 = vcombine.low %v4908_v37, %v4909_v43  ;;  %v2009_v25 = vrot.slane %v1993_v46, %v5202_v14  ;;  %v5443_v0 = vrot.slane %v4899_v53, %v5202_v14 }
  0x56   : > { %v1768_v57 = vcombine.high %v5422_v50, %v5422_v50  ;;  %v5434_v59 = vrot.slane %v1790_v52, %v5202_v14  ;;  %v1895_v60 = vunpack.i.h.s16 %v5422_v50  ;;  %v1897_v61 = vunpack.i.h.s16 %v1767_v51 }
  0x57   : > { %5040 = vmatprep.mubr.msk.bf16.mxu1 %vm740_vm0, %v1991_v54  ;;  %v2016_v58 = vrot.slane %v1994_v55, %v5202_v14  ;;  %v2024_v62 = vcombine.low %v2002_v1, %v2009_v25  ;;  %v4910_v63 = vpack.i.b16 %v5422_v50, %v5381_v11  ;;  %v1828_v20 = vcombine.high %v4900_v23, %v4900_v23 }
  0x58   : > { %v1899_v3 = vunpack.i.h.s16 %v1768_v57  ;;  %v4911_v7 = vpack.i.b16 %v1767_v51, %v1895_v60  ;;  %v4912_v8 = vpack.i.b16 %v1768_v57, %v1897_v61  ;;  %v4919_v9 = vcombine.high %v5429_v56, %v5434_v59 }
  0x59   : > { %v2025_v12 = vcombine.low %v2016_v58, %v2023_v49  ;;  %v2032_v19 = vrot.slane %v2024_v62, %v5202_v14  ;;  %v2041_v1 = vcombine.low %v5407_v35, %v4910_v63  ;;  %v1835_v27 = vrot.slane %v4900_v23, %v5202_v14  ;;  %v5105_v49 = vld [vmem:[%s6478_s1 + $0x38] sm:$0xff]  }
  0x5a   : > { %v4913_v22 = vpack.i.b16 %v5418_v48, %v1899_v3  ;;  %v2042_v24 = vcombine.low %v4911_v7, %v4912_v8  ;;  %v2072_v26 = vrot.slane %v4919_v9, %v5202_v14  ;;  %v5458_v34 = vrot.slane %v1828_v20, %v5202_v14 }
  0x5b   : > { %v2039_v29 = vrot.slane %v2025_v12, %v5202_v14  ;;  %v2051_v13 = vrot.slane %v2041_v1, %v5202_v14  ;;  %v5461_v37 = vrot.slane %v4901_v10, %v5202_v14  ;;  %v5465_v42 = vcombine.high %v1835_v27, %v1835_v27 }
  0x5c   : > { %v2043_v39 = vcombine.low %v4913_v22, %v5434_v59  ;;  %v2058_v40 = vrot.slane %v2042_v24, %v5202_v14  ;;  %v2799_v43 = vcombine.high %v5339_v44, %v5339_v44  ;;  %v5474_v51 = vcombine.high %v5458_v34, %v5458_v34 }
  0x5d   : > { %v2040_v46 = vcombine.low %v2032_v19, %v2039_v29  ;;  %v1909_v52 = vunpack.i.h.s16 %v5458_v34  ;;  %v4914_v53 = vpack.i.b16 %v5458_v34, %v5443_v0  ;;  %v1911_v25 = vunpack.i.h.s16 %v5465_v42 }
  0x5e   : > { %v2065_v54 = vrot.slane %v2043_v39, %v5202_v14  ;;  %v2073_v55 = vcombine.low %v2051_v13, %v2058_v40  ;;  %v2800_v44 = vcombine.high %v5343_v47, %v5343_v47  ;;  %v1913_v57 = vunpack.i.h.s16 %v5474_v51 }
  0x5f   : > { %5041 = vmatmul.mubr.msk.bf16.vlgmr.msra.gmra.mrb[8].mxu1 %vm740_vm0, %v2040_v46  ;;  %v4915_v61 = vpack.i.b16 %v5465_v42, %v1909_v52  ;;  %v3005_v23 = vunpack.i.h.s16 %v5313_v30  ;;  %v3007_v58 = vunpack.i.h.s16 %v5315_v31  ;;  %v4916_v3 = vpack.i.b16 %v5474_v51, %v1911_v25 }
  0x60   : > { %5049 = vmatpush3.bf16.msra.mxu1 %v5277_v33  ;;  %v2074_v62 = vcombine.low %v2065_v54, %v2072_v26  ;;  %v2081_v63 = vrot.slane %v2073_v55, %v5202_v14  ;;  %v3009_v7 = vunpack.i.h.s16 %v5330_v38  ;;  %v4917_v8 = vpack.i.b16 %v5461_v37, %v1913_v57 }
  0x61   : > { %5050 = vmatprep.subr.bf16.mxu1 %v5105_v49  ;;  %v2090_v9 = vcombine.low %v4914_v53, %v4915_v61  ;;  %v3011_v10 = vunpack.i.h.s16 %v5309_v28  ;;  %v3019_v12 = vunpack.i.h.s16 %v5343_v47  ;;  %v3021_v19 = vunpack.i.h.s16 %v2799_v43 }
  0x62   : > { %v2088_v30 = vrot.slane %v2074_v62, %v5202_v14  ;;  %v3023_v1 = vunpack.i.h.s16 %v2800_v44  ;;  %v4946_v33 = vpack.i.b16 %v5315_v31, %v3005_v23  ;;  %v2091_v20 = vcombine.low %v4916_v3, %v4917_v8 }
  0x63   : > { %v2098_v22 = vrot.slane %v2090_v9, %v5202_v14  ;;  %v4947_v24 = vpack.i.b16 %v5330_v38, %v3007_v58  ;;  %v4948_v26 = vpack.i.b16 %v5309_v28, %v3009_v7  ;;  %v3064_v29 = vpack.i.b16 %v1867_v45, %v3011_v10 }
  0x64   : > { %v2089_v27 = vcombine.low %v2081_v63, %v2088_v30  ;;  %5051 = vmatpush3.bf16.msra.mxu1 %v5105_v49  ;;  %v4949_v13 = vpack.i.b16 %v2799_v43, %v3019_v12  ;;  %v4950_v47 = vpack.i.b16 %v2800_v44, %v3021_v19  ;;  %v2105_v39 = vrot.slane %v2091_v20, %v5202_v14 }
  0x65   : > { %v3089_v40 = vcombine.low %v4946_v33, %v4947_v24  ;;  %v4958_v31 = vcombine.high %v5318_v32, %v5322_v36  ;;  %v3025_v46 = vunpack.i.h.s16 %v5355_v17  ;;  %v3090_v38 = vcombine.low %v4948_v26, %v3064_v29 }
  0x66   : > { %5044 = vmatprep.mubr.msk.bf16.mxu1 %vm740_vm0, %v2089_v27  ;;  %v3092_v28 = vcombine.low %v5325_v5, %v4949_v13  ;;  %v3033_v49 = vunpack.i.h.s16 %v5389_v16  ;;  %v3035_v53 = vunpack.i.h.s16 %v5394_v21  ;;  %v2106_v45 = vcombine.low %v2098_v22, %v2105_v39 }
  0x67   : > { %v3099_v43 = vrot.slane %v3089_v40, %v5202_v14  ;;  %v3113_v54 = vrot.slane %v4958_v31, %v5202_v14  ;;  %v4951_v55 = vpack.i.b16 %v5355_v17, %v3023_v1  ;;  %v3106_v32 = vrot.slane %v3090_v38, %v5202_v14 }
  0x68   : > { %v3120_v36 = vrot.slane %v3092_v28, %v5202_v14  ;;  %v3071_v25 = vpack.i.b16 %v1881_v18, %v3025_v46  ;;  %v4952_v5 = vpack.i.b16 %v5394_v21, %v3033_v49  ;;  %v2113_v16 = vrot.slane %v2106_v45, %v5202_v14 }
  0x69   : > { %v4953_v44 = vpack.i.b16 %v5407_v35, %v3035_v53  ;;  %v3138_v57 = vcombine.low %v4950_v47, %v4951_v55  ;;  %v3140_v61 = vcombine.low %v5386_v15, %v5370_v2  ;;  %v3121_v23 = vcombine.low %v3099_v43, %v3106_v32 }
  0x6a   : > { %v3122_v58 = vcombine.low %v3113_v54, %v3120_v36  ;;  %v3139_v17 = vcombine.low %v3071_v25, %v5376_v6  ;;  %v2951_v62 = vcombine.high %v5429_v56, %v5429_v56  ;;  %5045 = vmatmul.mubr.msk.bf16.gmra.mrb[12].mxu1 %vm740_vm0, %v2113_v16  ;;  %v2952_v63 = vcombine.high %v5434_v59, %v5434_v59 }
  0x6b   : > { %v3141_v4 = vcombine.low %v4952_v5, %v4953_v44  ;;  %v3148_v18 = vrot.slane %v3138_v57, %v5202_v14  ;;  %v3162_v21 = vrot.slane %v3140_v61, %v5202_v14  ;;  %v3129_v3 = vrot.slane %v3121_v23, %v5202_v14  ;;  %v4966_v5 = vld [vmem:[%s6479_s2] ss:$0 sm:$0xff] }
  0x6c   : > { %v3136_v2 = vrot.slane %v3122_v58, %v5202_v14  ;;  %v3155_v15 = vrot.slane %v3139_v17, %v5202_v14  ;;  %v3037_v6 = vunpack.i.h.s16 %v5407_v35  ;;  %v3039_v7 = vunpack.i.h.s16 %v5381_v11  ;;  %v3983_v61 = vld [vmem:[%s6480_s3] sm:$0x7f] }
  0x6d   : > { %v3169_v56 = vrot.slane %v3141_v4, %v5202_v14  ;;  %v3047_v8 = vunpack.i.h.s16 %v5434_v59  ;;  %v3049_v9 = vunpack.i.h.s16 %v2951_v62  ;;  %v3051_v30 = vunpack.i.h.s16 %v2952_v63 }
  0x6e   : > { %v3137_v10 = vcombine.low %v3129_v3, %v3136_v2  ;;  %v3170_v12 = vcombine.low %v3148_v18, %v3155_v15  ;;  %v4954_v19 = vpack.i.b16 %v5381_v11, %v3037_v6  ;;  %v3078_v33 = vpack.i.b16 %v1895_v60, %v3039_v7 }
  0x6f   : > { %v3171_v1 = vcombine.low %v3162_v21, %v3169_v56  ;;  %v4955_v20 = vpack.i.b16 %v2951_v62, %v3047_v8  ;;  %v4956_v22 = vpack.i.b16 %v2952_v63, %v3049_v9  ;;  %v4957_v24 = vpack.i.b16 %v5443_v0, %v3051_v30 }
  0x70   : > { %5052 = vmatprep.mubr.msk.bf16.mxu1 %vm740_vm0, %v3137_v10  ;;  %v3178_v35 = vrot.slane %v3170_v12, %v5202_v14  ;;  %v4959_v59 = vcombine.high %v5413_v41, %v5422_v50  ;;  %v3053_v26 = vunpack.i.h.s16 %v5443_v0  ;;  %v3187_v11 = vcombine.low %v4954_v19, %v3078_v33 }
  0x71   : > { %v3185_v27 = vrot.slane %v3171_v1, %v5202_v14  ;;  %v3189_v29 = vcombine.low %v5418_v48, %v4955_v20  ;;  %v3237_v60 = vcombine.low %v5474_v51, %v5461_v37  ;;  %v3190_v13 = vcombine.low %v4956_v22, %v4957_v24 }
  0x72   : > { %v3204_v47 = vrot.slane %v4959_v59, %v5202_v14  ;;  %v3085_v39 = vpack.i.b16 %v1909_v52, %v3053_v26  ;;  %v3197_v31 = vrot.slane %v3187_v11, %v5202_v14  ;;  %v3816_v23 = vcombine.high %v4966_v5, %v4966_v5 }
  0x73   : > { %v3186_v40 = vcombine.low %v3178_v35, %v3185_v27  ;;  %v3211_v41 = vrot.slane %v3189_v29, %v5202_v14  ;;  %v3218_v50 = vrot.slane %v3190_v13, %v5202_v14  ;;  %v3251_v48 = vrot.slane %v3237_v60, %v5202_v14 }
  0x74   : > { %v3236_v0 = vcombine.low %v3085_v39, %v5465_v42  ;;  %v3219_v37 = vcombine.low %v3197_v31, %v3204_v47  ;;  %v3823_v58 = vrot.slane %v4966_v5, %v5202_v14  ;;  %v3985_v17 = vcombine.high %v3983_v61, %v3983_v61 }
  0x75   : > { %5053 = vmatmul.mubr.msk.bf16.vlgmr.msra.gmra.mrb[16].mxu1 %vm740_vm0, %v3186_v40  ;;  %v3220_v51 = vcombine.low %v3211_v41, %v3218_v50  ;;  %v3992_v62 = vrot.slane %v3983_v61, %v5202_v14  ;;  %v3830_v4 = vrot.slane %v3816_v23, %v5202_v14 }
  0x76   : > { %v3244_v46 = vrot.slane %v3236_v0, %v5202_v14  ;;  %v3227_v34 = vrot.slane %v3219_v37, %v5202_v14  ;;  %v3831_v18 = vcombine.high %v3823_v58, %v3823_v58  ;;  %v3999_v63 = vrot.slane %v3985_v17, %v5202_v14 }
  0x77   : > { %v3234_v52 = vrot.slane %v3220_v51, %v5202_v14  ;;  %v4000_v3 = vcombine.high %v3992_v62, %v3992_v62  ;;  %v5581_v15 = vrot.slane %v3823_v58, %v5202_v14  ;;  %v5584_v6 = vrot.slane %v3830_v4, %v5202_v14 }
  0x78   : > { %v3252_v38 = vcombine.low %v3244_v46, %v3251_v48  ;;  %v5587_v56 = vrot.slane %v3831_v18, %v5202_v14  ;;  %v3832_v8 = vcombine.high %v3830_v4, %v3830_v4  ;;  %v5590_v9 = vrot.slane %v3992_v62, %v5202_v14 }
  0x79   : > { %v3235_v28 = vcombine.low %v3227_v34, %v3234_v52  ;;  %v5595_v30 = vrot.slane %v3999_v63, %v5202_v14  ;;  %v4001_v1 = vcombine.high %v3999_v63, %v3999_v63  ;;  %v5598_v33 = vrot.slane %v4000_v3, %v5202_v14 }
  0x7a   : > { %v3259_v49 = vrot.slane %v3252_v38, %v5202_v14  ;;  %6492 = vst [vmem:[#allocation2_spill] sm:$0xff] %v5590_v9  ;;  %v5602_v35 = vcombine.high %v5581_v15, %v5581_v15  ;;  %v5606_v24 = vcombine.high %v5584_v6, %v5584_v6  ;;  %v5610_v59 = vcombine.high %v5587_v56, %v5587_v56 }
  0x7b   : > { %5056 = vmatprep.mubr.msk.bf16.mxu1 %vm740_vm0, %v3235_v28  ;;  %6493 = vst [vmem:[#allocation3_spill] sm:$0xff] %v5595_v30  ;;  %6494 = vst [vmem:[#allocation4_spill] sm:$0xff] %v5598_v33  ;;  %v5617_v29 = vrot.slane %v3832_v8, %v5202_v14  ;;  %v5621_v60 = vcombine.high %v5590_v9, %v5590_v9  ;;  %v5628_v31 = vcombine.high %v5595_v30, %v5595_v30 }
  0x7c   : > { %v5633_v37 = vrot.slane %v4001_v1, %v5202_v14  ;;  %v5637_v51 = vcombine.high %v5598_v33, %v5598_v33 }
  0x7d   : > { %5057 = vmatmul.mubr.msk.bf16.gmra.mrb[20].mxu1 %vm740_vm0, %v3259_v49 }
  0x7e   : > { %6495 = vst [vmem:[#allocation5_spill] sm:$0xff] %v5633_v37 }
 0x107   : > { %v5018_v42 = vpop.f32.mrb[0].mxu1 }
 0x108   : > { %v787_v53 = vpop.f32.mrb[1].mxu1 }
 0x109   : > { %v5019_v45 = vpop.f32.mrb[2].mxu1 }
 0x10a   : > { %v790_v43 = vpop.f32.mrb[3].mxu1 }
 0x10b   : > { %v5030_v54 = vpop.f32.mrb[0].mxu0 }
 0x10c   : > { %v1091_v55 = vadd.f32 %v5030_v54, %v5018_v42  ;;  %v1082_v32 = vpop.f32.mrb[1].mxu0 }
 0x10d   : > { %v1083_v36 = vadd.f32 %v1082_v32, %v787_v53  ;;  %v5031_v25 = vpop.f32.mrb[2].mxu0 }
 0x10e   : > { %v1094_v16 = vadd.f32 %v5031_v25, %v5019_v45  ;;  %v1085_v44 = vpop.f32.mrb[3].mxu0  ;;  %v1217_v21 = vcombine.high %v1091_v55, %v1091_v55  ;;  %v1224_v2 = vrot.slane %v1091_v55, %v5202_v14 }
 0x10f   : > { %v5570_v57 = vadd.f32 %v1085_v44, %v790_v43  ;;  %v1119_v7 = vcombine.high %v1083_v36, %v1083_v36  ;;  %v1126_v12 = vrot.slane %v1083_v36, %v5202_v14 }
 0x110   : > { %v1231_v10 = vrot.slane %v1217_v21, %v5202_v14  ;;  %v1266_v19 = vcombine.high %v1094_v16, %v1094_v16  ;;  %v1232_v20 = vcombine.high %v1224_v2, %v1224_v2  ;;  %v5613_v26 = vrot.slane %v1224_v2, %v5202_v14 }
 0x111   : > { %v1133_v27 = vrot.slane %v1119_v7, %v5202_v14  ;;  %v1134_v47 = vcombine.high %v1126_v12, %v1126_v12  ;;  %v5624_v39 = vrot.slane %v1126_v12, %v5202_v14  ;;  %v1273_v41 = vrot.slane %v1094_v16, %v5202_v14 }
 0x112   : > { %v1233_v13 = vcombine.high %v1231_v10, %v1231_v10  ;;  %v1280_v50 = vrot.slane %v1266_v19, %v5202_v14  ;;  %v5640_v46 = vrot.slane %v1231_v10, %v5202_v14  ;;  %v5643_v34 = vrot.slane %v1232_v20, %v5202_v14 }
 0x113   : > { %v1168_v52 = vcombine.high %v5570_v57, %v5570_v57  ;;  %v1135_v42 = vcombine.high %v1133_v27, %v1133_v27  ;;  %v5650_v53 = vrot.slane %v1133_v27, %v5202_v14  ;;  %v5656_v55 = vrot.slane %v1134_v47, %v5202_v14 }
 0x114   : > { %v5653_v54 = vrot.slane %v1233_v13, %v5202_v14  ;;  %v1281_v5 = vcombine.high %v1273_v41, %v1273_v41  ;;  %v1282_v16 = vcombine.high %v1280_v50, %v1280_v50  ;;  %v1175_v17 = vrot.slane %v5570_v57, %v5202_v14 }
 0x115   : > { %v1182_v62 = vrot.slane %v1168_v52, %v5202_v14  ;;  %v5668_v4 = vrot.slane %v1135_v42, %v5202_v14  ;;  %v5671_v18 = vrot.slane %v1273_v41, %v5202_v14  ;;  %v5675_v3 = vrot.slane %v1280_v50, %v5202_v14 }
 0x116   : > { %v5685_v12 = vrot.slane %v1281_v5, %v5202_v14  ;;  %v5688_v19 = vrot.slane %v1282_v16, %v5202_v14  ;;  %v1183_v20 = vcombine.high %v1175_v17, %v1175_v17  ;;  %v6499_v9 = vcombine.high %v5653_v54, %v5653_v54 }
 0x117   : > { %v5708_v42 = vrot.slane %v1182_v62, %v5202_v14 }
 0x11c   : > { %v5022_v22 = vpop.f32.mrb[4].mxu1 }
 0x11d   : > { %v803_v11 = vpop.f32.mrb[5].mxu1 }
 0x11e   : > { %v5023_v40 = vpop.f32.mrb[6].mxu1  ;;  %v5034_v0 = vpop.f32.mrb[4].mxu0 }
 0x11f   : > { %v806_v48 = vpop.f32.mrb[7].mxu1  ;;  %v1107_v38 = vadd.f32 %v5034_v0, %v5022_v22  ;;  %v1098_v28 = vpop.f32.mrb[5].mxu0  ;;  %v1184_v22 = vcombine.high %v1182_v62, %v1182_v62 }
 0x120   : > { %v1099_v45 = vadd.f32 %v1098_v28, %v803_v11  ;;  %v5035_v43 = vpop.f32.mrb[6].mxu0  ;;  %v5705_v28 = vrot.slane %v1175_v17, %v5202_v14 }
 0x121   : > { %v1413_v36 = vcombine.high %v1107_v38, %v1107_v38  ;;  %v1101_v25 = vpop.f32.mrb[7].mxu0  ;;  %v1420_v21 = vrot.slane %v1107_v38, %v5202_v14  ;;  %v5714_v43 = vrot.slane %v1184_v22, %v5202_v14 }
 0x122   : > { %v1315_v44 = vcombine.high %v1099_v45, %v1099_v45  ;;  %v1102_v61 = vadd.f32 %v1101_v25, %v806_v48  ;;  %v1322_v7 = vrot.slane %v1099_v45, %v5202_v14  ;;  %v5711_v45 = vrot.slane %v1183_v20, %v5202_v14 }
 0x123   : > { %v1427_v2 = vrot.slane %v1413_v36, %v5202_v14  ;;  %v1428_v47 = vcombine.high %v1420_v21, %v1420_v21  ;;  %v5717_v5 = vrot.slane %v1420_v21, %v5202_v14 }
 0x124   : > { %v1364_v63 = vcombine.high %v1102_v61, %v1102_v61  ;;  %v1329_v57 = vrot.slane %v1315_v44, %v5202_v14  ;;  %v1371_v27 = vrot.slane %v1102_v61, %v5202_v14  ;;  %v1330_v0 = vcombine.high %v1322_v7, %v1322_v7 }
 0x125   : > { %v1429_v50 = vcombine.high %v1427_v2, %v1427_v2  ;;  %v5720_v16 = vrot.slane %v1427_v2, %v5202_v14  ;;  %v5723_v44 = vrot.slane %v1428_v47, %v5202_v14  ;;  %v5726_v61 = vrot.slane %v1322_v7, %v5202_v14 }
 0x126   : > { %v1378_v40 = vrot.slane %v1364_v63, %v5202_v14  ;;  %v1331_v48 = vcombine.high %v1329_v57, %v1329_v57  ;;  %v1379_v36 = vcombine.high %v1371_v27, %v1371_v27  ;;  %v5732_v62 = vrot.slane %v1329_v57, %v5202_v14 }
 0x127   : > { %v5729_v17 = vrot.slane %v1429_v50, %v5202_v14  ;;  %v5735_v63 = vrot.slane %v1330_v0, %v5202_v14  ;;  %v5745_v7 = vrot.slane %v1371_v27, %v5202_v14 }
 0x128   : > { %v1380_v25 = vcombine.high %v1378_v40, %v1378_v40  ;;  %v5738_v21 = vrot.slane %v1331_v48, %v5202_v14  ;;  %v5748_v22 = vrot.slane %v1378_v40, %v5202_v14  ;;  %v5755_v50 = vrot.slane %v1379_v36, %v5202_v14 }
 0x12a   : > { %v5758_v0 = vrot.slane %v1380_v25, %v5202_v14 }
 0x132   : > { %v5042_v20 = vpop.f32.mrb[8].mxu1 }
 0x133   : > { %v2307_v57 = vcombine.high %v5042_v20, %v5042_v20  ;;  %v2314_v2 = vrot.slane %v5042_v20, %v5202_v14  ;;  %v2172_v47 = vpop.f32.mrb[9].mxu1 }
 0x134   : > { %v2209_v38 = vcombine.high %v2172_v47, %v2172_v47  ;;  %v2216_v48 = vrot.slane %v2172_v47, %v5202_v14  ;;  %v5043_v41 = vpop.f32.mrb[10].mxu1 }
 0x135   : > { %v2321_v52 = vrot.slane %v2307_v57, %v5202_v14  ;;  %v2322_v27 = vcombine.high %v2314_v2, %v2314_v2  ;;  %v2330_v13 = vrot.slane %v2314_v2, %v5202_v14  ;;  %v2356_v40 = vcombine.high %v5043_v41, %v5043_v41  ;;  %v2175_v11 = vpop.f32.mrb[11].mxu1 }
 0x136   : > { %v2223_v20 = vrot.slane %v2209_v38, %v5202_v14  ;;  %v2224_v8 = vcombine.high %v2216_v48, %v2216_v48  ;;  %v2232_v10 = vrot.slane %v2216_v48, %v5202_v14  ;;  %v2363_v36 = vrot.slane %v5043_v41, %v5202_v14 }
 0x137   : > { %v2323_v32 = vcombine.high %v2321_v52, %v2321_v52  ;;  %v2337_v25 = vrot.slane %v2321_v52, %v5202_v14  ;;  %v2344_v47 = vrot.slane %v2322_v27, %v5202_v14  ;;  %v2352_v1 = vcombine.high %v2330_v13, %v2330_v13 }
 0x138   : > { %v5794_v57 = vadd.f32 %v2330_v13, %v5613_v26  ;;  %v2225_v23 = vcombine.high %v2223_v20, %v2223_v20  ;;  %v2239_v2 = vrot.slane %v2223_v20, %v5202_v14  ;;  %v2246_v58 = vrot.slane %v2224_v8, %v5202_v14 }
 0x139   : > { %v2351_v38 = vrot.slane %v2323_v32, %v5202_v14  ;;  %v2353_v49 = vcombine.high %v2337_v25, %v2337_v25  ;;  %v2354_v48 = vcombine.high %v2344_v47, %v2344_v47  ;;  %v5800_v41 = vadd.f32 %v2344_v47, %v5643_v34 }
 0x13a   : > { %v6496_v52 = vcombine.high %v5613_v26, %v5613_v26  ;;  %v5808_v13 = vadd.f32 %v2337_v25, %v5640_v46  ;;  %v2253_v33 = vrot.slane %v2225_v23, %v5202_v14  ;;  %v2254_v20 = vcombine.high %v2232_v10, %v2232_v10 }
 0x13b   : > { %v2355_v37 = vcombine.high %v2351_v38, %v2351_v38  ;;  %v6497_v32 = vcombine.high %v5643_v34, %v5643_v34  ;;  %v5817_v47 = vadd.f32 %v2351_v38, %v5653_v54  ;;  %v6498_v26 = vcombine.high %v5640_v46, %v5640_v46 }
 0x13c   : > { %v5805_v27 = vadd.f32 %v2352_v1, %v6496_v52  ;;  %v2255_v52 = vcombine.high %v2239_v2, %v2239_v2  ;;  %v2256_v25 = vcombine.high %v2246_v58, %v2246_v58  ;;  %v2257_v30 = vcombine.high %v2253_v33, %v2253_v33 }
 0x13d   : > { %v5814_v8 = vadd.f32 %v2354_v48, %v6497_v32  ;;  %v5822_v1 = vadd.f32 %v2353_v49, %v6498_v26  ;;  %v5825_v23 = vadd.f32 %v2232_v10, %v5624_v39  ;;  %v5830_v34 = vadd.f32 %v2355_v37, %v6499_v9 }
 0x13e   : > { %v5833_v48 = vadd.f32 %v2246_v58, %v5656_v55  ;;  %v6500_v38 = vcombine.high %v5624_v39, %v5624_v39  ;;  %v5841_v49 = vadd.f32 %v2239_v2, %v5650_v53  ;;  %v6503_v10 = vcombine.high %v5656_v55, %v5656_v55  ;;  %v5046_v2 = vpop.f32.mrb[12].mxu1 }
 0x13f   : > { %v5849_v54 = vadd.f32 %v2253_v33, %v5668_v4  ;;  %v6506_v9 = vcombine.high %v5650_v53, %v5650_v53  ;;  %v6508_v39 = vcombine.high %v5668_v4, %v5668_v4  ;;  %v2371_v26 = vcombine.high %v2363_v36, %v2363_v36 }
 0x140   : > { %v5838_v46 = vadd.f32 %v2254_v20, %v6500_v38  ;;  %6502 = vst [vmem:[#allocation7_spill] sm:$0xff] %v5841_v49  ;;  %v5846_v32 = vadd.f32 %v2256_v25, %v6503_v10  ;;  %v2370_v20 = vrot.slane %v2356_v40, %v5202_v14  ;;  %v2379_v55 = vrot.slane %v2363_v36, %v5202_v14  ;;  %v2188_v38 = vpop.f32.mrb[13].mxu1 }
 0x141   : > { %6505 = vst [vmem:[#allocation9_spill] sm:$0xff] %v5849_v54  ;;  %v5854_v37 = vadd.f32 %v2255_v52, %v6506_v9  ;;  %v5859_v58 = vadd.f32 %v2257_v30, %v6508_v39  ;;  %v2258_v25 = vcombine.high %v2175_v11, %v2175_v11  ;;  %v2265_v33 = vrot.slane %v2175_v11, %v5202_v14  ;;  %v5047_v9 = vpop.f32.mrb[14].mxu1 }
 0x142   : > { %6501 = vst [vmem:[#allocation6_spill] sm:$0xff] %v5838_v46  ;;  %6504 = vst [vmem:[#allocation8_spill] sm:$0xff] %v5846_v32  ;;  %v2503_v10 = vcombine.high %v5046_v2, %v5046_v2  ;;  %v2510_v53 = vrot.slane %v5046_v2, %v5202_v14  ;;  %v2405_v52 = vcombine.high %v2188_v38, %v2188_v38 }
 0x143   : > { %6507 = vst [vmem:[#allocation10_spill] sm:$0xff] %v5854_v37  ;;  %6509 = vst [vmem:[#allocation11_spill] sm:$0xff] %v5859_v58  ;;  %v2372_v37 = vcombine.high %v2370_v20, %v2370_v20  ;;  %v2386_v4 = vrot.slane %v2370_v20, %v5202_v14  ;;  %v2393_v30 = vrot.slane %v2371_v26, %v5202_v14  ;;  %v5867_v58 = vpop.f32.mrb[15].mxu1 }
 0x144   : > { %v2401_v39 = vcombine.high %v2379_v55, %v2379_v55  ;;  %v5870_v40 = vadd.f32 %v2379_v55, %v5671_v18  ;;  %v2272_v36 = vrot.slane %v2258_v25, %v5202_v14  ;;  %v2273_v32 = vcombine.high %v2265_v33, %v2265_v33 }
 0x145   : > { %v2281_v11 = vrot.slane %v2265_v33, %v5202_v14  ;;  %v2400_v2 = vrot.slane %v2372_v37, %v5202_v14  ;;  %v2402_v54 = vcombine.high %v2386_v4, %v2386_v4  ;;  %v2403_v9 = vcombine.high %v2393_v30, %v2393_v30 }
 0x146   : > { %6510 = vst [vmem:[#allocation12_spill] sm:$0xff] %v5870_v40  ;;  %v5876_v49 = vadd.f32 %v2393_v30, %v5685_v12  ;;  %v6512_v20 = vcombine.high %v5671_v18, %v5671_v18  ;;  %v5884_v55 = vadd.f32 %v2386_v4, %v5675_v3  ;;  %v2274_v40 = vcombine.high %v2272_v36, %v2272_v36 }
 0x147   : > { %v2288_v25 = vrot.slane %v2272_v36, %v5202_v14  ;;  %v2404_v46 = vcombine.high %v2400_v2, %v2400_v2  ;;  %v6514_v37 = vcombine.high %v5685_v12, %v5685_v12  ;;  %v5893_v30 = vadd.f32 %v2400_v2, %v5688_v19 }
 0x148   : > { %6511 = vst [vmem:[#allocation13_spill] sm:$0xff] %v5876_v49  ;;  %v5881_v26 = vadd.f32 %v2401_v39, %v6512_v20  ;;  %v6515_v18 = vcombine.high %v5675_v3, %v5675_v3  ;;  %v2295_v4 = vrot.slane %v2273_v32, %v5202_v14  ;;  %v2302_v20 = vrot.slane %v2274_v40, %v5202_v14 }
 0x149   : > { %v5890_v33 = vadd.f32 %v2403_v9, %v6514_v37  ;;  %v2304_v36 = vcombine.high %v2288_v25, %v2288_v25  ;;  %v6516_v49 = vcombine.high %v5688_v19, %v5688_v19  ;;  %v5908_v9 = vadd.f32 %v2281_v11, %v5705_v28  ;;  %v5922_v19 = vpop.f32.mrb[16].mxu1 }
 0x14a   : > { %6513 = vst [vmem:[#allocation14_spill] sm:$0xff] %v5881_v26  ;;  %v5898_v39 = vadd.f32 %v2402_v54, %v6515_v18  ;;  %v2303_v26 = vcombine.high %v2281_v11, %v2281_v11  ;;  %v5911_v2 = vadd.f32 %v2288_v25, %v5708_v42  ;;  %v2517_v3 = vrot.slane %v2503_v10, %v5202_v14 }
 0x14b   : > { %v5905_v12 = vadd.f32 %v2404_v46, %v6516_v49  ;;  %v2305_v54 = vcombine.high %v2295_v4, %v2295_v4  ;;  %v2306_v37 = vcombine.high %v2302_v20, %v2302_v20  ;;  %v5915_v32 = vadd.f32 %v2295_v4, %v5711_v45 }
 0x14c   : > { %6517 = vst [vmem:[#allocation15_spill] sm:$0xff] %v5911_v2  ;;  %v6518_v40 = vcombine.high %v5705_v28, %v5705_v28  ;;  %v5925_v46 = vadd.f32 %v2302_v20, %v5714_v43  ;;  %v6520_v49 = vcombine.high %v5708_v42, %v5708_v42  ;;  %v2518_v10 = vcombine.high %v2510_v53, %v2510_v53  ;;  %v5932_v2 = vpop.f32.mrb[17].mxu1 }
 0x14d   : > { %v2519_v25 = vcombine.high %v2517_v3, %v2517_v3  ;;  %v6522_v4 = vcombine.high %v5711_v45, %v5711_v45  ;;  %v2526_v20 = vrot.slane %v2510_v53, %v5202_v14  ;;  %v2533_v42 = vrot.slane %v2517_v3, %v5202_v14 }
 0x14e   : > { %v5920_v18 = vadd.f32 %v2303_v26, %v6518_v40  ;;  %6519 = vst [vmem:[#allocation16_spill] sm:$0xff] %v5925_v46  ;;  %v5930_v11 = vadd.f32 %v2304_v36, %v6520_v49  ;;  %v6523_v26 = vcombine.high %v5714_v43, %v5714_v43  ;;  %v5946_v36 = vpop.f32.mrb[18].mxu1  ;;  %v2540_v49 = vrot.slane %v2518_v10, %v5202_v14 }
 0x14f   : > { %v5937_v28 = vadd.f32 %v2305_v54, %v6522_v4  ;;  %v2412_v46 = vrot.slane %v2188_v38, %v5202_v14  ;;  %v2419_v45 = vrot.slane %v2405_v52, %v5202_v14  ;;  %v5952_v54 = vpop.f32.mrb[19].mxu1  ;;  %v2548_v4 = vcombine.high %v2526_v20, %v2526_v20 }
 0x150   : > { %6521 = vst [vmem:[#allocation17_spill] sm:$0xff] %v5930_v11  ;;  %v5942_v40 = vadd.f32 %v2306_v37, %v6523_v26  ;;  %v2547_v11 = vrot.slane %v2519_v25, %v5202_v14  ;;  %v2549_v43 = vcombine.high %v2533_v42, %v2533_v42  ;;  %v5955_v37 = vadd.f32 %v2526_v20, %v5717_v5 }
 0x151   : > { %v5958_v53 = vadd.f32 %v2533_v42, %v5720_v16  ;;  %v2550_v3 = vcombine.high %v2540_v49, %v2540_v49  ;;  %v5961_v10 = vadd.f32 %v2540_v49, %v5723_v44  ;;  %v6528_v38 = vcombine.high %v5717_v5, %v5717_v5 }
 0x152   : > { %6524 = vst [vmem:[#allocation18_spill] sm:$0xff] %v5942_v40  ;;  %6525 = vst [vmem:[#allocation19_spill] sm:$0xff] %v5955_v37  ;;  %v2551_v26 = vcombine.high %v2547_v11, %v2547_v11  ;;  %v5964_v25 = vadd.f32 %v2547_v11, %v5729_v17  ;;  %v6529_v20 = vcombine.high %v5720_v16, %v5720_v16 }
 0x153   : > { %6526 = vst [vmem:[#allocation20_spill] sm:$0xff] %v5958_v53  ;;  %v5969_v52 = vadd.f32 %v2548_v4, %v6528_v38  ;;  %v2420_v42 = vcombine.high %v2412_v46, %v2412_v46  ;;  %v2421_v53 = vcombine.high %v2419_v45, %v2419_v45  ;;  %v6531_v40 = vcombine.high %v5723_v44, %v5723_v44 }
 0x154   : > { %6527 = vst [vmem:[#allocation21_spill] sm:$0xff] %v5964_v25  ;;  %v5974_v37 = vadd.f32 %v2549_v43, %v6529_v20  ;;  %v6533_v11 = vcombine.high %v5729_v17, %v5729_v17  ;;  %v2428_v5 = vrot.slane %v2412_v46, %v5202_v14  ;;  %v2435_v4 = vrot.slane %v2419_v45, %v5202_v14 }
 0x155   : > { %v5979_v49 = vadd.f32 %v2550_v3, %v6531_v40  ;;  %v2442_v16 = vrot.slane %v2420_v42, %v5202_v14  ;;  %v2449_v43 = vrot.slane %v2421_v53, %v5202_v14  ;;  %v2454_v38 = vcombine.high %v5867_v58, %v5867_v58  ;;  %v5994_v40 = vpop.f32.mrb[20].mxu1 }
 0x156   : > { %6530 = vst [vmem:[#allocation22_spill] sm:$0xff] %v5974_v37  ;;  %v5984_v25 = vadd.f32 %v2551_v26, %v6533_v11  ;;  %v2461_v44 = vrot.slane %v5867_v58, %v5202_v14  ;;  %v2450_v3 = vcombine.high %v2428_v5, %v2428_v5  ;;  %v2451_v17 = vcombine.high %v2435_v4, %v2435_v4  ;;  %v6002_v45 = vpop.f32.mrb[21].mxu1 }
 0x157   : > { %6532 = vst [vmem:[#allocation23_spill] sm:$0xff] %v5979_v49  ;;  %v5997_v26 = vadd.f32 %v2428_v5, %v5726_v61  ;;  %v6000_v46 = vadd.f32 %v2435_v4, %v5732_v62  ;;  %v2452_v20 = vcombine.high %v2442_v16, %v2442_v16  ;;  %v2453_v53 = vcombine.high %v2449_v43, %v2449_v43  ;;  %v5059_v58 = vpop.f32.mrb[22].mxu1 }
 0x158   : > { %6534 = vst [vmem:[#allocation24_spill] sm:$0xff] %v5984_v25  ;;  %v6005_v42 = vadd.f32 %v2442_v16, %v5735_v63  ;;  %v6008_v11 = vadd.f32 %v2449_v43, %v5738_v21  ;;  %v6537_v25 = vcombine.high %v5726_v61, %v5726_v61  ;;  %v6538_v5 = vcombine.high %v5732_v62, %v5732_v62  ;;  %v6021_v49 = vpop.f32.mrb[23].mxu1 }
 0x159   : > { %6535 = vst [vmem:[#allocation25_spill] sm:$0xff] %v5997_v26  ;;  %6536 = vst [vmem:[#allocation26_spill] sm:$0xff] %v6000_v46  ;;  %v2468_v46 = vrot.slane %v2454_v38, %v5202_v14  ;;  %v2469_v26 = vcombine.high %v2461_v44, %v2461_v44  ;;  %v6541_v16 = vcombine.high %v5735_v63, %v5735_v63 }
 0x15a   : > { %v6013_v37 = vadd.f32 %v2450_v3, %v6537_v25  ;;  %v6018_v4 = vadd.f32 %v2451_v17, %v6538_v5  ;;  %6540 = vst [vmem:[#allocation28_spill] sm:$0xff] %v6021_v49  ;;  %v6542_v61 = vcombine.high %v5738_v21, %v5738_v21  ;;  %v2477_v3 = vrot.slane %v2461_v44, %v5202_v14 }
 0x15b   : > { %v6026_v43 = vadd.f32 %v2452_v20, %v6541_v16  ;;  %v3453_v62 = vcombine.high %v5922_v19, %v5922_v19  ;;  %v2470_v17 = vcombine.high %v2468_v46, %v2468_v46  ;;  %v2484_v38 = vrot.slane %v2468_v46, %v5202_v14 }
 0x15c   : > { %6539 = vst [vmem:[#allocation27_spill] sm:$0xff] %v6018_v4  ;;  %v6031_v25 = vadd.f32 %v2453_v53, %v6542_v61  ;;  %v2491_v58 = vrot.slane %v2469_v26, %v5202_v14  ;;  %v3460_v63 = vrot.slane %v5922_v19, %v5202_v14  ;;  %v2499_v20 = vcombine.high %v2477_v3, %v2477_v3 }
 0x15d   : > { %v6041_v5 = vadd.f32 %v2477_v3, %v5745_v7  ;;  %v3467_v21 = vrot.slane %v3453_v62, %v5202_v14  ;;  %v3355_v44 = vcombine.high %v5932_v2, %v5932_v2  ;;  %v2498_v53 = vrot.slane %v2470_v17, %v5202_v14 }
 0x15e   : > { %6543 = vst [vmem:[#allocation29_spill] sm:$0xff] %v6031_v25  ;;  %v2500_v16 = vcombine.high %v2484_v38, %v2484_v38  ;;  %v2501_v61 = vcombine.high %v2491_v58, %v2491_v58  ;;  %v6048_v46 = vadd.f32 %v2491_v58, %v5755_v50  ;;  %v6546_v26 = vcombine.high %v5745_v7, %v5745_v7 }
 0x15f   : > { %6544 = vst [vmem:[#allocation30_spill] sm:$0xff] %v6041_v5  ;;  %v6056_v3 = vadd.f32 %v2484_v38, %v5748_v22  ;;  %v3468_v5 = vcombine.high %v3460_v63, %v3460_v63  ;;  %v3469_v62 = vcombine.high %v3467_v21, %v3467_v21  ;;  %v2502_v49 = vcombine.high %v2498_v53, %v2498_v53 }
 0x160   : > { %6545 = vst [vmem:[#allocation31_spill] sm:$0xff] %v6048_v46  ;;  %v6053_v19 = vadd.f32 %v2499_v20, %v6546_v26  ;;  %v6549_v25 = vcombine.high %v5755_v50, %v5755_v50  ;;  %v6064_v4 = vadd.f32 %v2498_v53, %v5758_v0  ;;  %v6552_v58 = vcombine.high %v5748_v22, %v5748_v22 }
 0x161   : > { %6548 = vst [vmem:[#allocation33_spill] sm:$0xff] %v6056_v3  ;;  %v3476_v20 = vrot.slane %v3460_v63, %v5202_v14  ;;  %v3483_v38 = vrot.slane %v3467_v21, %v5202_v14  ;;  %v3490_v26 = vrot.slane %v3468_v5, %v5202_v14  ;;  %v3497_v3 = vrot.slane %v3469_v62, %v5202_v14 }
 0x162   : > { %6547 = vst [vmem:[#allocation32_spill] sm:$0xff] %v6053_v19  ;;  %v6061_v17 = vadd.f32 %v2501_v61, %v6549_v25  ;;  %6551 = vst [vmem:[#allocation35_spill] sm:$0xff] %v6064_v4  ;;  %v6069_v7 = vadd.f32 %v2500_v16, %v6552_v58  ;;  %v6554_v50 = vcombine.high %v5758_v0, %v5758_v0  ;;  %v6563_v4 = vld [vmem:[#allocation8_spill] sm:$0xff] }
 0x163   : > { %v3362_v53 = vrot.slane %v5932_v2, %v5202_v14  ;;  %v3369_v22 = vrot.slane %v3355_v44, %v5202_v14  ;;  %v3498_v63 = vcombine.high %v3476_v20, %v3476_v20  ;;  %v3499_v61 = vcombine.high %v3483_v38, %v3483_v38 }
 0x164   : > { %6550 = vst [vmem:[#allocation34_spill] sm:$0xff] %v6061_v17  ;;  %6553 = vst [vmem:[#allocation36_spill] sm:$0xff] %v6069_v7  ;;  %v6078_v25 = vadd.f32 %v2502_v49, %v6554_v50  ;;  %v3500_v21 = vcombine.high %v3490_v26, %v3490_v26  ;;  %v3501_v58 = vcombine.high %v3497_v3, %v3497_v3  ;;  %v6564_v17 = vld [vmem:[#allocation10_spill] sm:$0xff] }
 0x165   : > { %v3770_v5 = vadd.f32 %v3476_v20, %v5794_v57  ;;  %v3771_v62 = vadd.f32 %v3490_v26, %v5800_v41  ;;  %v3774_v0 = vadd.f32 %v3483_v38, %v5808_v13  ;;  %v3775_v49 = vadd.f32 %v3497_v3, %v5817_v47 }
 0x166   : > { %6555 = vst [vmem:[#allocation37_spill] sm:$0xff] %v6078_v25  ;;  %v3772_v50 = vadd.f32 %v3498_v63, %v5805_v27  ;;  %v3773_v2 = vadd.f32 %v3500_v21, %v5814_v8  ;;  %v3776_v44 = vadd.f32 %v3499_v61, %v5822_v1  ;;  %v3777_v16 = vadd.f32 %v3501_v58, %v5830_v34 }
 0x167   : > { %v3887_v25 = vadd.f32 %v5602_v35, %v3770_v5  ;;  %v3888_v7 = vadd.f32 %v5610_v59, %v3771_v62  ;;  %v3891_v57 = vadd.f32 %v5606_v24, %v3774_v0  ;;  %v3892_v41 = vadd.f32 %v5581_v15, %v3775_v49  ;;  %v6556_v62 = vld [vmem:[#allocation2_spill] sm:$0xff]  ;;  %v6557_v49 = vld [vmem:[#allocation3_spill] sm:$0xff] }
 0x168   : > { %v3889_v13 = vadd.f32 %v5584_v6, %v3772_v50  ;;  %v3890_v47 = vadd.f32 %v5617_v29, %v3773_v2  ;;  %v3893_v27 = vadd.f32 %v5587_v56, %v3776_v44  ;;  %v6101_v8 = vadd.f32 %v5602_v35, %v3777_v16  ;;  %v6558_v50 = vld [vmem:[#allocation5_spill] sm:$0xff] }
 0x169   : > { %v3943_v1 = vmax.f32 %v3887_v25, 0.0  ;;  %v3944_v3 = vmax.f32 %v3888_v7, 0.0  ;;  %v3947_v34 = vmax.f32 %v3891_v57, 0.0  ;;  %v3948_v20 = vmax.f32 %v3892_v41, 0.0  ;;  %v6559_v7 = vld [vmem:[#allocation4_spill] sm:$0xff] }
 0x16a   : > { %v3945_v38 = vmax.f32 %v3889_v13, 0.0  ;;  %v3946_v26 = vmax.f32 %v3890_v47, 0.0  ;;  %v3949_v63 = vmax.f32 %v3893_v27, 0.0  ;;  %v3950_v61 = vmax.f32 %v6101_v8, 0.0 }
 0x16b   : > { %v4056_v21 = vadd.f32 %v5621_v60, %v3943_v1  ;;  %v4057_v58 = vadd.f32 %v5637_v51, %v3944_v3  ;;  %v4060_v5 = vadd.f32 %v5628_v31, %v3947_v34  ;;  %v4061_v0 = vadd.f32 %v6556_v62, %v3948_v20 }
 0x16c   : > { %v4058_v16 = vadd.f32 %v6557_v49, %v3945_v38  ;;  %v4059_v25 = vadd.f32 %v6558_v50, %v3946_v26  ;;  %v4062_v2 = vadd.f32 %v6559_v7, %v3949_v63  ;;  %v3370_v44 = vcombine.high %v3362_v53, %v3362_v53 }
 0x16d   : > { %v4249_v57 = vcombine.low %v4056_v21, %v4057_v58  ;;  %v4278_v41 = vrot.slane %v4060_v5, %v5202_v14  ;;  %v3371_v13 = vcombine.high %v3369_v22, %v3369_v22  ;;  %v3378_v47 = vrot.slane %v3362_v53, %v5202_v14 }
 0x16e   : > { %v4250_v27 = vcombine.low %v4058_v16, %v4059_v25  ;;  %v4296_v8 = vcombine.low %v4061_v0, %v4062_v2  ;;  %v3385_v1 = vrot.slane %v3369_v22, %v5202_v14  ;;  %v3392_v3 = vrot.slane %v3370_v44, %v5202_v14  ;;  %v6560_v0 = vld [vmem:[#allocation6_spill] sm:$0xff]  ;;  %v6561_v22 = vld [vmem:[#allocation7_spill] sm:$0xff]  ;;  %v6562_v2 = vld [vmem:[#allocation9_spill] sm:$0xff] }
 0x16f   : > { %v6116_v34 = vrot.slane %v4249_v57, %v5202_v14  ;;  %v3399_v20 = vrot.slane %v3371_v13, %v5202_v14  ;;  %v3400_v38 = vcombine.high %v3378_v47, %v3378_v47  ;;  %v3754_v26 = vadd.f32 %v3378_v47, %v5825_v23  ;;  %v6565_v47 = vld [vmem:[#allocation11_spill] sm:$0xff] }
 0x170   : > { %v4271_v63 = vrot.slane %v4250_v27, %v5202_v14  ;;  %v3401_v21 = vcombine.high %v3385_v1, %v3385_v1  ;;  %v3402_v58 = vcombine.high %v3392_v3, %v3392_v3  ;;  %v3755_v53 = vadd.f32 %v3392_v3, %v5833_v48 }
 0x171   : > { %v3403_v5 = vcombine.high %v3399_v20, %v3399_v20  ;;  %v3756_v16 = vadd.f32 %v3400_v38, %v6560_v0  ;;  %v3758_v25 = vadd.f32 %v3385_v1, %v6561_v22  ;;  %v3759_v44 = vadd.f32 %v3399_v20, %v6562_v2 }
 0x172   : > { %v6125_v57 = vcombine.low %v4271_v63, %v4278_v41  ;;  %v3757_v13 = vadd.f32 %v3402_v58, %v6563_v4  ;;  %v3760_v19 = vadd.f32 %v3401_v21, %v6564_v17  ;;  %v3871_v23 = vadd.f32 %v5581_v15, %v3754_v26 }
 0x173   : > { %v3761_v27 = vadd.f32 %v3403_v5, %v6565_v47  ;;  %v3872_v46 = vadd.f32 %v5587_v56, %v3755_v53  ;;  %v3873_v48 = vadd.f32 %v5602_v35, %v3756_v16  ;;  %v3875_v3 = vadd.f32 %v5584_v6, %v3758_v25 }
 0x174   : > { %v3874_v41 = vadd.f32 %v5610_v59, %v3757_v13  ;;  %v3876_v20 = vadd.f32 %v5617_v29, %v3759_v44  ;;  %v3877_v4 = vadd.f32 %v5606_v24, %v3760_v19  ;;  %v3927_v38 = vmax.f32 %v3871_v23, 0.0 }
 0x175   : > { %v6140_v17 = vadd.f32 %v5581_v15, %v3761_v27  ;;  %v3928_v26 = vmax.f32 %v3872_v46, 0.0  ;;  %v3929_v63 = vmax.f32 %v3873_v48, 0.0  ;;  %v3931_v58 = vmax.f32 %v3875_v3, 0.0 }
 0x176   : > { %v3930_v21 = vmax.f32 %v3874_v41, 0.0  ;;  %v3932_v53 = vmax.f32 %v3876_v20, 0.0  ;;  %v3933_v5 = vmax.f32 %v3877_v4, 0.0  ;;  %v4040_v16 = vadd.f32 %v6556_v62, %v3927_v38 }
 0x177   : > { %v4041_v22 = vadd.f32 %v6559_v7, %v3928_v26  ;;  %v4042_v25 = vadd.f32 %v5621_v60, %v3929_v63  ;;  %v4044_v2 = vadd.f32 %v6557_v49, %v3931_v58  ;;  %v3509_v23 = vrot.slane %v5946_v36, %v5202_v14 }
 0x178   : > { %v4043_v19 = vadd.f32 %v5637_v51, %v3930_v21  ;;  %v4045_v44 = vadd.f32 %v6558_v50, %v3932_v53  ;;  %v4046_v46 = vadd.f32 %v5628_v31, %v3933_v5  ;;  %v6566_v47 = vcombine.high %v5946_v36, %v5946_v36 }
 0x179   : > { %v4152_v13 = vcombine.low %v4040_v16, %v4041_v22  ;;  %v6157_v48 = vadd.f32 %v5621_v60, %v3950_v61  ;;  %v6161_v4 = vrot.slane %v4296_v8, %v5202_v14  ;;  %v3517_v26 = vcombine.high %v3509_v23, %v3509_v23  ;;  %v6567_v22 = vld [vmem:[#allocation12_spill] sm:$0xff] }
 0x17a   : > { %v3516_v27 = vrot.slane %v6566_v47, %v5202_v14  ;;  %v4153_v3 = vcombine.low %v4042_v25, %v4043_v19  ;;  %v4154_v41 = vcombine.low %v4044_v2, %v4045_v44  ;;  %v4182_v20 = vrot.slane %v4046_v46, %v5202_v14  ;;  %v6568_v47 = vld [vmem:[#allocation13_spill] sm:$0xff] }
 0x17b   : > { %v4161_v38 = vrot.slane %v4152_v13, %v5202_v14  ;;  %v3525_v21 = vrot.slane %v3509_v23, %v5202_v14  ;;  %v3404_v53 = vcombine.high %v5952_v54, %v5952_v54  ;;  %v3539_v5 = vrot.slane %v3517_v26, %v5202_v14 }
 0x17c   : > { %v3518_v63 = vcombine.high %v3516_v27, %v3516_v27  ;;  %v4168_v58 = vrot.slane %v4153_v3, %v5202_v14  ;;  %v4175_v36 = vrot.slane %v4154_v41, %v5202_v14  ;;  %v3532_v61 = vrot.slane %v3516_v27, %v5202_v14  ;;  %v6569_v27 = vld [vmem:[#allocation14_spill] sm:$0xff] }
 0x17d   : > { %v3547_v16 = vcombine.high %v3525_v21, %v3525_v21  ;;  %v3778_v25 = vadd.f32 %v3525_v21, %v6567_v22  ;;  %v3549_v13 = vcombine.high %v3539_v5, %v3539_v5  ;;  %v3779_v3 = vadd.f32 %v3539_v5, %v6568_v47 }
 0x17e   : > { %v3546_v8 = vrot.slane %v3518_v63, %v5202_v14  ;;  %v4183_v19 = vcombine.low %v4161_v38, %v4168_v58  ;;  %v4184_v2 = vcombine.low %v4175_v36, %v4182_v20  ;;  %v3548_v44 = vcombine.high %v3532_v61, %v3532_v61 }
 0x17f   : > { %v3782_v46 = vadd.f32 %v3532_v61, %v5884_v55  ;;  %v3780_v41 = vadd.f32 %v3547_v16, %v6569_v27  ;;  %v3781_v38 = vadd.f32 %v3549_v13, %v5890_v33  ;;  %v3895_v55 = vadd.f32 %v5610_v59, %v3778_v25 }
 0x180   : > { %v3550_v23 = vcombine.high %v3546_v8, %v3546_v8  ;;  %v4191_v1 = vrot.slane %v4183_v19, %v5202_v14  ;;  %v4198_v26 = vrot.slane %v4184_v2, %v5202_v14  ;;  %v3783_v63 = vadd.f32 %v3546_v8, %v5893_v30 }
 0x181   : > { %v3784_v0 = vadd.f32 %v3548_v44, %v5898_v39  ;;  %v3896_v21 = vadd.f32 %v5584_v6, %v3779_v3  ;;  %v3897_v36 = vadd.f32 %v5617_v29, %v3780_v41  ;;  %v3899_v61 = vadd.f32 %v5581_v15, %v3782_v46 }
 0x182   : > { %v3785_v20 = vadd.f32 %v3550_v23, %v5905_v12  ;;  %v4199_v58 = vcombine.low %v4191_v1, %v4198_v26  ;;  %v3900_v5 = vadd.f32 %v5587_v56, %v3783_v63  ;;  %v3898_v16 = vadd.f32 %v5606_v24, %v3781_v38 }
 0x183   : > { %v3901_v30 = vadd.f32 %v5602_v35, %v3784_v0  ;;  %v3951_v33 = vmax.f32 %v3895_v55, 0.0  ;;  %v3952_v8 = vmax.f32 %v3896_v21, 0.0  ;;  %v3953_v22 = vmax.f32 %v3897_v36, 0.0 }
 0x184   : > { %v3902_v39 = vadd.f32 %v5610_v59, %v3785_v20  ;;  %v4545_v12 = vsel %vm4544_vm1, %v4199_v58, -inf  ;;  %v3955_v25 = vmax.f32 %v3899_v61, 0.0  ;;  %v3954_v1 = vmax.f32 %v3898_v16, 0.0 }
 0x185   : > { %v4546_v19 = vrot.slane %v4545_v12, 4  ;;  %v3956_v2 = vmax.f32 %v3900_v5, 0.0  ;;  %v3957_v44 = vmax.f32 %v3901_v30, 0.0  ;;  %v4064_v46 = vadd.f32 %v5637_v51, %v3951_v33 }
 0x186   : > { %v3958_v13 = vmax.f32 %v3902_v39, 0.0  ;;  %v4065_v23 = vadd.f32 %v6557_v49, %v3952_v8  ;;  %v4066_v47 = vadd.f32 %v6558_v50, %v3953_v22  ;;  %v4067_v3 = vadd.f32 %v5628_v31, %v3954_v1 }
 0x187   : > { %v4547_v0 = vmax.f32 %v4545_v12, %v4546_v19  ;;  %v4068_v27 = vadd.f32 %v6556_v62, %v3955_v25  ;;  %v4069_v41 = vadd.f32 %v6559_v7, %v3956_v2  ;;  %v4070_v26 = vadd.f32 %v5621_v60, %v3957_v44 }
 0x188   : > { %v4071_v63 = vadd.f32 %v5637_v51, %v3958_v13  ;;  %v4297_v38 = vcombine.low %v6157_v48, %v4064_v46  ;;  %v4298_v20 = vcombine.low %v4065_v23, %v4066_v47  ;;  %v4326_v21 = vrot.slane %v4067_v3, %v5202_v14 }
 0x189   : > { %v4548_v55 = vrot.slane %v4547_v0, 2  ;;  %v4344_v58 = vcombine.low %v4068_v27, %v4069_v41  ;;  %v3411_v36 = vrot.slane %v5952_v54, %v5202_v14  ;;  %v3418_v30 = vrot.slane %v3404_v53, %v5202_v14 }
 0x18a   : > { %v4312_v61 = vrot.slane %v4297_v38, %v5202_v14  ;;  %v4319_v5 = vrot.slane %v4298_v20, %v5202_v14  ;;  %v4345_v16 = vcombine.low %v4070_v26, %v4071_v63 }
 0x18b   : > { %v4549_v39 = vmax.f32 %v4547_v0, %v4548_v55  ;;  %v4353_v33 = vrot.slane %v4344_v58, %v5202_v14  ;;  %v3419_v12 = vcombine.high %v3411_v36, %v3411_v36  ;;  %v3427_v48 = vrot.slane %v3411_v36, %v5202_v14 }
 0x18c   : > { %v4327_v8 = vcombine.low %v6161_v4, %v4312_v61  ;;  %v4328_v22 = vcombine.low %v4319_v5, %v4326_v21  ;;  %v4360_v25 = vrot.slane %v4345_v16, %v5202_v14  ;;  %v3420_v19 = vcombine.high %v3418_v30, %v3418_v30  ;;  %v6570_v21 = vld [vmem:[#allocation15_spill] sm:$0xff]  ;;  %v6571_v61 = vld [vmem:[#allocation16_spill] sm:$0xff]  ;;  %v6572_v16 = vld [vmem:[#allocation17_spill] sm:$0xff] }
 0x18d   : > { %v4550_v54 = vrot.slane %v4549_v39, 1  ;;  %v3434_v1 = vrot.slane %v3418_v30, %v5202_v14  ;;  %v3441_v2 = vrot.slane %v3419_v12, %v5202_v14  ;;  %v3449_v44 = vcombine.high %v3427_v48, %v3427_v48  ;;  %v6573_v30 = vld [vmem:[#allocation18_spill] sm:$0xff] }
 0x18e   : > { %v4335_v53 = vrot.slane %v4327_v8, %v5202_v14  ;;  %v4342_v13 = vrot.slane %v4328_v22, %v5202_v14  ;;  %v4375_v46 = vcombine.low %v4353_v33, %v4360_v25  ;;  %v3448_v23 = vrot.slane %v3420_v19, %v5202_v14 }
 0x18f   : > { %v4551_v47 = vmax.f32 %v4549_v39, %v4550_v54  ;;  %v3450_v0 = vcombine.high %v3434_v1, %v3434_v1  ;;  %v3451_v4 = vcombine.high %v3441_v2, %v3441_v2  ;;  %v3762_v3 = vadd.f32 %v3427_v48, %v5908_v9 }
 0x190   : > { %v4343_v27 = vcombine.low %v4335_v53, %v4342_v13  ;;  %v6217_v41 = vrot.slane %v4375_v46, %v5202_v14  ;;  %v3452_v26 = vcombine.high %v3448_v23, %v3448_v23  ;;  %v3763_v63 = vadd.f32 %v3441_v2, %v5915_v32 }
 0x191   : > { %v4601_v38 = vpack.c.bf16 %v4551_v47, %v4551_v47  ;;  %v3764_v20 = vadd.f32 %v3449_v44, %v5920_v18  ;;  %v3765_v55 = vadd.f32 %v3451_v4, %v5937_v28  ;;  %v3766_v58 = vadd.f32 %v3434_v1, %v6570_v21 }
 0x192   : > { %v4566_v36 = vsel %vm4544_vm1, %v4343_v27, -inf  ;;  %v3767_v5 = vadd.f32 %v3448_v23, %v6571_v61  ;;  %v3768_v9 = vadd.f32 %v3450_v0, %v6572_v16  ;;  %v3769_v39 = vadd.f32 %v3452_v26, %v6573_v30 }
 0x193   : > { %v6227_v33 = vunpack.c.l.b16 %v4601_v38  ;;  %v4567_v12 = vrot.slane %v4566_v36, 4  ;;  %v3879_v32 = vadd.f32 %v5587_v56, %v3762_v3  ;;  %v3880_v48 = vadd.f32 %v5602_v35, %v3763_v63 }
 0x194   : > { %v3881_v18 = vadd.f32 %v5610_v59, %v3764_v20  ;;  %v3882_v28 = vadd.f32 %v5584_v6, %v3765_v55  ;;  %v3883_v8 = vadd.f32 %v5617_v29, %v3766_v58  ;;  %v3884_v22 = vadd.f32 %v5606_v24, %v3767_v5 }
 0x195   : > { %v4568_v25 = vmax.f32 %v4566_v36, %v4567_v12  ;;  %v3885_v19 = vadd.f32 %v5581_v15, %v3768_v9  ;;  %v3886_v54 = vadd.f32 %v5587_v56, %v3769_v39  ;;  %v3935_v1 = vmax.f32 %v3879_v32, 0.0 }
 0x196   : > { %v3936_v2 = vmax.f32 %v3880_v48, 0.0  ;;  %v3937_v44 = vmax.f32 %v3881_v18, 0.0  ;;  %v3938_v53 = vmax.f32 %v3882_v28, 0.0  ;;  %v3939_v13 = vmax.f32 %v3883_v8, 0.0 }
 0x197   : > { %v4569_v46 = vrot.slane %v4568_v25, 2  ;;  %v3940_v23 = vmax.f32 %v3884_v22, 0.0  ;;  %v3941_v47 = vmax.f32 %v3885_v19, 0.0  ;;  %v3942_v0 = vmax.f32 %v3886_v54, 0.0 }
 0x198   : > { %v6574_v4 = vmax.f32 %v6140_v17, 0.0  ;;  %v4048_v27 = vadd.f32 %v6559_v7, %v3935_v1  ;;  %v4049_v26 = vadd.f32 %v5621_v60, %v3936_v2  ;;  %v4050_v63 = vadd.f32 %v5637_v51, %v3937_v44 }
 0x199   : > { %v6243_v38 = vmax.f32 %v4568_v25, %v4569_v46  ;;  %v4051_v20 = vadd.f32 %v6557_v49, %v3938_v53  ;;  %v4052_v55 = vadd.f32 %v6558_v50, %v3939_v13  ;;  %v4053_v21 = vadd.f32 %v5628_v31, %v3940_v23 }
 0x19a   : > { %v4047_v3 = vadd.f32 %v6556_v62, %v6574_v4  ;;  %v4054_v58 = vadd.f32 %v6556_v62, %v3941_v47  ;;  %v4055_v17 = vadd.f32 %v6559_v7, %v3942_v0  ;;  %v4201_v61 = vcombine.low %v4049_v26, %v4050_v63 }
 0x19b   : > { %v4571_v5 = vrot.slane %v6243_v38, 1  ;;  %v4202_v16 = vcombine.low %v4051_v20, %v4052_v55  ;;  %v4230_v9 = vrot.slane %v4053_v21, %v5202_v14  ;;  %v3649_v30 = vcombine.high %v5994_v40, %v5994_v40 }
 0x19c   : > { %v4200_v36 = vcombine.low %v4047_v3, %v4048_v27  ;;  %v4216_v12 = vrot.slane %v4201_v61, %v5202_v14  ;;  %v4248_v32 = vcombine.low %v4054_v58, %v4055_v17  ;;  %v3656_v48 = vrot.slane %v5994_v40, %v5202_v14  ;;  %v6575_v3 = vld [vmem:[#allocation19_spill] sm:$0xff] }
 0x19d   : > { %v4223_v18 = vrot.slane %v4202_v16, %v5202_v14  ;;  %v3663_v28 = vrot.slane %v3649_v30, %v5202_v14  ;;  %v3551_v8 = vcombine.high %v6002_v45, %v6002_v45  ;;  %v6264_v22 = vrot.slane %v6002_v45, %v5202_v14  ;;  %v6579_v30 = vld [vmem:[#allocation23_spill] sm:$0xff] }
 0x19e   : > { %v4209_v39 = vrot.slane %v4200_v36, %v5202_v14  ;;  %v4257_v19 = vrot.slane %v4248_v32, %v5202_v14  ;;  %v3664_v54 = vcombine.high %v3656_v48, %v3656_v48  ;;  %v3672_v1 = vrot.slane %v3656_v48, %v5202_v14  ;;  %v6577_v36 = vld [vmem:[#allocation21_spill] sm:$0xff] }
 0x19f   : > { %v4232_v2 = vcombine.low %v4223_v18, %v4230_v9  ;;  %v3665_v44 = vcombine.high %v3663_v28, %v3663_v28  ;;  %v3679_v40 = vrot.slane %v3663_v28, %v5202_v14  ;;  %v6270_v53 = vrot.slane %v3551_v8, %v5202_v14  ;;  %v6581_v18 = vld [vmem:[#allocation24_spill] sm:$0xff] }
 0x1a0   : > { %v4231_v25 = vcombine.low %v4209_v39, %v4216_v12  ;;  %v4279_v46 = vcombine.low %v4257_v19, %v6116_v34  ;;  %v3686_v45 = vrot.slane %v3664_v54, %v5202_v14  ;;  %v3694_v23 = vcombine.high %v3672_v1, %v3672_v1  ;;  %v6576_v34 = vld [vmem:[#allocation20_spill] sm:$0xff]  ;;  %v6580_v12 = vld [vmem:[#allocation22_spill] sm:$0xff] }
 0x1a1   : > { %v4246_v47 = vrot.slane %v4232_v2, %v5202_v14  ;;  %v3693_v0 = vrot.slane %v3665_v44, %v5202_v14  ;;  %v3695_v4 = vcombine.high %v3679_v40, %v3679_v40  ;;  %v3802_v27 = vadd.f32 %v3672_v1, %v6575_v3 }
 0x1a2   : > { %v4239_v13 = vrot.slane %v4231_v25, %v5202_v14  ;;  %v4287_v26 = vrot.slane %v4279_v46, %v5202_v14  ;;  %v3696_v63 = vcombine.high %v3686_v45, %v3686_v45  ;;  %v3803_v20 = vadd.f32 %v3686_v45, %v5961_v10 }
 0x1a3   : > { %v3804_v55 = vadd.f32 %v3694_v23, %v5969_v52  ;;  %v3697_v58 = vcombine.high %v3693_v0, %v3693_v0  ;;  %v3806_v17 = vadd.f32 %v3679_v40, %v6576_v34  ;;  %v3807_v61 = vadd.f32 %v3693_v0, %v6577_v36 }
 0x1a4   : > { %v4247_v21 = vcombine.low %v4239_v13, %v4246_v47  ;;  %v6578_v16 = vrot.slane %v6125_v57, %v5202_v14  ;;  %v3805_v39 = vadd.f32 %v3696_v63, %v6579_v30  ;;  %v3808_v32 = vadd.f32 %v3695_v4, %v6580_v12 }
 0x1a5   : > { %v3919_v48 = vadd.f32 %v5606_v24, %v3802_v27  ;;  %v3809_v52 = vadd.f32 %v3697_v58, %v6581_v18  ;;  %v3920_v28 = vadd.f32 %v5581_v15, %v3803_v20  ;;  %v3921_v8 = vadd.f32 %v5587_v56, %v3804_v55 }
 0x1a6   : > { %v4295_v9 = vcombine.low %v4287_v26, %v6578_v16  ;;  %v4552_v10 = vsel %vm4544_vm1, %v4247_v21, -inf  ;;  %v3922_v57 = vadd.f32 %v5602_v35, %v3805_v39  ;;  %v3923_v54 = vadd.f32 %v5610_v59, %v3806_v17 }
 0x1a7   : > { %v4553_v25 = vrot.slane %v4552_v10, 4  ;;  %v3924_v2 = vadd.f32 %v5584_v6, %v3807_v61  ;;  %v3925_v44 = vadd.f32 %v5617_v29, %v3808_v32  ;;  %v3926_v40 = vadd.f32 %v5606_v24, %v3809_v52 }
 0x1a8   : > { %v4559_v19 = vsel %vm4544_vm1, %v4295_v9, -inf  ;;  %v3975_v46 = vmax.f32 %v3919_v48, 0.0  ;;  %v3976_v45 = vmax.f32 %v3920_v28, 0.0  ;;  %v3977_v23 = vmax.f32 %v3921_v8, 0.0 }
 0x1a9   : > { %v4560_v1 = vrot.slane %v4559_v19, 4  ;;  %v4554_v13 = vmax.f32 %v4552_v10, %v4553_v25  ;;  %v3978_v0 = vmax.f32 %v3922_v57, 0.0  ;;  %v3979_v4 = vmax.f32 %v3923_v54, 0.0 }
 0x1aa   : > { %v3980_v3 = vmax.f32 %v3924_v2, 0.0  ;;  %v3981_v26 = vmax.f32 %v3925_v44, 0.0  ;;  %v3982_v63 = vmax.f32 %v3926_v40, 0.0  ;;  %v6300_v20 = vadd.f32 %v5628_v31, %v3975_v46 }
 0x1ab   : > { %v4561_v47 = vmax.f32 %v4559_v19, %v4560_v1  ;;  %v4555_v27 = vrot.slane %v4554_v13, 2  ;;  %v4089_v21 = vadd.f32 %v6556_v62, %v3976_v45  ;;  %v4090_v58 = vadd.f32 %v6559_v7, %v3977_v23 }
 0x1ac   : > { %v4091_v34 = vadd.f32 %v5621_v60, %v3978_v0  ;;  %v4092_v36 = vadd.f32 %v5637_v51, %v3979_v4  ;;  %v4093_v61 = vadd.f32 %v6557_v49, %v3980_v3  ;;  %v4094_v16 = vadd.f32 %v6558_v50, %v3981_v26 }
 0x1ad   : > { %v4562_v55 = vrot.slane %v4561_v47, 2  ;;  %v4556_v17 = vmax.f32 %v4554_v13, %v4555_v27  ;;  %v4095_v30 = vadd.f32 %v5628_v31, %v3982_v63  ;;  %v4470_v39 = vrot.slane %v6300_v20, %v5202_v14  ;;  %v6582_v13 = vld [vmem:[#allocation25_spill] sm:$0xff] }
 0x1ae   : > { %v4488_v12 = vcombine.low %v4089_v21, %v4090_v58  ;;  %v4489_v48 = vcombine.low %v4091_v34, %v4092_v36  ;;  %v4490_v10 = vcombine.low %v4093_v61, %v4094_v16  ;;  %v3566_v18 = vcombine.high %v6264_v22, %v6264_v22  ;;  %v6585_v61 = vld [vmem:[#allocation29_spill] sm:$0xff] }
 0x1af   : > { %v6308_v9 = vmax.f32 %v4561_v47, %v4562_v55  ;;  %v4557_v32 = vrot.slane %v4556_v17, 1  ;;  %v4518_v28 = vrot.slane %v4095_v30, %v5202_v14  ;;  %v3567_v8 = vcombine.high %v6270_v53, %v6270_v53  ;;  %v6583_v55 = vld [vmem:[#allocation26_spill] sm:$0xff] }
 0x1b0   : > { %v4497_v52 = vrot.slane %v4488_v12, %v5202_v14  ;;  %v3574_v25 = vrot.slane %v6264_v22, %v5202_v14  ;;  %v4504_v57 = vrot.slane %v4489_v48, %v5202_v14  ;;  %v4511_v54 = vrot.slane %v4490_v10, %v5202_v14 }
 0x1b1   : > { %v4558_v19 = vmax.f32 %v4556_v17, %v4557_v32  ;;  %v3581_v1 = vrot.slane %v6270_v53, %v5202_v14  ;;  %v3588_v2 = vrot.slane %v3566_v18, %v5202_v14  ;;  %v3595_v44 = vrot.slane %v3567_v8, %v5202_v14  ;;  %v6584_v17 = vld [vmem:[#allocation27_spill] sm:$0xff] }
 0x1b2   : > { %v3596_v40 = vcombine.high %v3574_v25, %v3574_v25  ;;  %v3786_v46 = vadd.f32 %v3574_v25, %v6582_v13  ;;  %v4519_v23 = vcombine.low %v4497_v52, %v4504_v57  ;;  %v4520_v47 = vcombine.low %v4511_v54, %v4518_v28 }
 0x1b3   : > { %v4602_v45 = vpack.c.bf16 %v4558_v19, %v4558_v19  ;;  %v3597_v0 = vcombine.high %v3581_v1, %v3581_v1  ;;  %v3598_v22 = vcombine.high %v3588_v2, %v3588_v2  ;;  %v3599_v4 = vcombine.high %v3595_v44, %v3595_v44 }
 0x1b4   : > { %v3787_v3 = vadd.f32 %v3588_v2, %v6005_v42  ;;  %v3788_v27 = vadd.f32 %v3596_v40, %v6013_v37  ;;  %v4527_v53 = vrot.slane %v4519_v23, %v5202_v14  ;;  %v4534_v63 = vrot.slane %v4520_v47, %v5202_v14  ;;  %v5107_v23 = vld [vmem:[%s6481_s4] sm:$0xff]  }
 0x1b5   : > { %v6330_v26 = vunpack.c.l.b16 %v4602_v45  ;;  %v3790_v21 = vadd.f32 %v3581_v1, %v6583_v55  ;;  %v3789_v58 = vadd.f32 %v3598_v22, %v6026_v43  ;;  %v3791_v34 = vadd.f32 %v3595_v44, %v6008_v11  ;;  %v6586_v22 = vld [vmem:[#allocation28_spill] sm:$0xff] }
 0x1b6   : > { %v3792_v36 = vadd.f32 %v3597_v0, %v6584_v17  ;;  %v3793_v16 = vadd.f32 %v3599_v4, %v6585_v61  ;;  %v6339_v30 = vcombine.low %v4527_v53, %v4534_v63  ;;  %v3903_v37 = vadd.f32 %v5584_v6, %v3786_v46 }
 0x1b7   : > { %v3904_v42 = vadd.f32 %v5617_v29, %v3787_v3  ;;  %v3905_v12 = vadd.f32 %v5606_v24, %v3788_v27  ;;  %v3906_v32 = vadd.f32 %v5581_v15, %v3789_v58  ;;  %v3907_v48 = vadd.f32 %v5587_v56, %v3790_v21 }
 0x1b8   : > { %v3908_v43 = vadd.f32 %v5602_v35, %v3791_v34  ;;  %v3909_v11 = vadd.f32 %v5610_v59, %v3792_v36  ;;  %v3910_v10 = vadd.f32 %v5584_v6, %v3793_v16  ;;  %v3959_v18 = vmax.f32 %v3903_v37, 0.0  ;;  %v5108_v16 = vld [vmem:[%s6481_s4 + $0x8] sm:$0xff]  }
 0x1b9   : > { %v3960_v52 = vmax.f32 %v3904_v42, 0.0  ;;  %v3961_v28 = vmax.f32 %v3905_v12, 0.0  ;;  %v3962_v8 = vmax.f32 %v3906_v32, 0.0  ;;  %v3963_v25 = vmax.f32 %v3907_v48, 0.0 }
 0x1ba   : > { %v3964_v19 = vmax.f32 %v3908_v43, 0.0  ;;  %v3965_v57 = vmax.f32 %v3909_v11, 0.0  ;;  %v3966_v54 = vmax.f32 %v3910_v10, 0.0  ;;  %v4072_v1 = vadd.f32 %v6557_v49, %v3959_v18  ;;  %v6587_v10 = vld [vmem:[#allocation30_spill] sm:$0xff] }
 0x1bb   : > { %v4073_v2 = vadd.f32 %v6558_v50, %v3960_v52  ;;  %v4074_v44 = vadd.f32 %v5628_v31, %v3961_v28  ;;  %v4075_v40 = vadd.f32 %v6556_v62, %v3962_v8  ;;  %v4076_v13 = vadd.f32 %v6559_v7, %v3963_v25 }
 0x1bc   : > { %v4077_v46 = vadd.f32 %v5621_v60, %v3964_v19  ;;  %v4078_v45 = vadd.f32 %v5637_v51, %v3965_v57  ;;  %v3600_v4 = vcombine.high %v6586_v22, %v6586_v22  ;;  %v3607_v3 = vrot.slane %v6586_v22, %v5202_v14 }
 0x1bd   : > { %v4346_v47 = vcombine.low %v4072_v1, %v4073_v2  ;;  %v4374_v0 = vrot.slane %v4074_v44, %v5202_v14  ;;  %v4392_v27 = vcombine.low %v4075_v40, %v4076_v13  ;;  %v6365_v63 = vadd.f32 %v6557_v49, %v3966_v54  ;;  %v6588_v54 = vld [vmem:[#allocation31_spill] sm:$0xff]  ;;  %v6589_v2 = vld [vmem:[#allocation32_spill] sm:$0xff]  ;;  %v6590_v40 = vld [vmem:[#allocation33_spill] sm:$0xff] }
 0x1be   : > { %v4393_v53 = vcombine.low %v4077_v46, %v4078_v45  ;;  %v3614_v21 = vrot.slane %v3600_v4, %v5202_v14  ;;  %v3615_v58 = vcombine.high %v3607_v3, %v3607_v3  ;;  %v3623_v34 = vrot.slane %v3607_v3, %v5202_v14  ;;  %v6593_v4 = vld [vmem:[#allocation36_spill] sm:$0xff] }
 0x1bf   : > { %v4367_v55 = vrot.slane %v4346_v47, %v5202_v14  ;;  %v5128_v17 = vmov 0.0   ;;  %v4401_v36 = vrot.slane %v4392_v27, %v5202_v14  ;;  %v4564_v37 = vrot.slane %v6308_v9, 1 }
 0x1c0   : > { %5060 = vmatprep.subr.bf16.mxu0 %v5128_v17  ;;  %v4408_v61 = vrot.slane %v4393_v53, %v5202_v14  ;;  %v3616_v12 = vcombine.high %v3614_v21, %v3614_v21  ;;  %v3630_v32 = vrot.slane %v3614_v21, %v5202_v14  ;;  %v3637_v48 = vrot.slane %v3615_v58, %v5202_v14  ;;  %v6594_v58 = vld [vmem:[#allocation37_spill] sm:$0xff] }
 0x1c1   : > { %5061 = vmatpush3.bf16.msra.mxu0 %v5107_v23  ;;  %v4376_v42 = vcombine.low %v4367_v55, %v4374_v0  ;;  %v3645_v11 = vcombine.high %v3623_v34, %v3623_v34  ;;  %v3794_v18 = vadd.f32 %v3623_v34, %v6587_v10  ;;  %5076 = vmatprep.mubr.msk.bf16.mxu0 %vm5129_vm2, %v5128_v17  ;;  %v6591_v23 = vld [vmem:[#allocation34_spill] sm:$0xff]  ;;  %v6592_v0 = vld [vmem:[#allocation35_spill] sm:$0xff] }
 0x1c2   : > { %5062 = vmatprep.subr.bf16.mxu0 %v5128_v17  ;;  %v4423_v43 = vcombine.low %v4401_v36, %v4408_v61  ;;  %v6383_v52 = vmax.f32 %v6308_v9, %v4564_v37  ;;  %v3644_v8 = vrot.slane %v3616_v12, %v5202_v14  ;;  %v3646_v25 = vcombine.high %v3630_v32, %v3630_v32  ;;  %v5109_v9 = vld [vmem:[%s6481_s4 + $0x10] sm:$0xff]  }
 0x1c3   : > { %v4390_v28 = vrot.slane %v4376_v42, %v5202_v14  ;;  %v3647_v19 = vcombine.high %v3637_v48, %v3637_v48  ;;  %v3795_v1 = vadd.f32 %v3637_v48, %v6588_v54  ;;  %v3796_v44 = vadd.f32 %v3645_v11, %v6589_v2 }
 0x1c4   : > { %v6388_v57 = vrot.slane %v4423_v43, %v5202_v14  ;;  %v3798_v13 = vadd.f32 %v3630_v32, %v6590_v40  ;;  %v3648_v45 = vcombine.high %v3644_v8, %v3644_v8  ;;  %v3799_v22 = vadd.f32 %v3644_v8, %v6592_v0 }
 0x1c5   : > { %5063 = vmatpush3.bf16.msra.mxu0 %v5108_v16  ;;  %v4391_v46 = vcombine.low %v6217_v41, %v4390_v28  ;;  %v3797_v47 = vadd.f32 %v3647_v19, %v6591_v23  ;;  %v3800_v3 = vadd.f32 %v3646_v25, %v6593_v4  ;;  %v3911_v27 = vadd.f32 %v5617_v29, %v3794_v18  ;;  %v5111_v19 = vld [vmem:[%s6481_s4 + $0x20] sm:$0xff]  }
 0x1c6   : > { %5064 = vmatprep.subr.bf16.mxu0 %v5128_v17  ;;  %v3912_v53 = vadd.f32 %v5606_v24, %v3795_v1  ;;  %v3913_v55 = vadd.f32 %v5581_v15, %v3796_v44  ;;  %v3801_v34 = vadd.f32 %v3648_v45, %v6594_v58  ;;  %v3915_v36 = vadd.f32 %v5602_v35, %v3798_v13  ;;  %v5110_v24 = vld [vmem:[%s6481_s4 + $0x18] sm:$0xff]  }
 0x1c7   : > { %v4573_v21 = vsel %vm4544_vm1, %v4391_v46, -inf  ;;  %v3914_v41 = vadd.f32 %v5587_v56, %v3797_v47  ;;  %v3916_v16 = vadd.f32 %v5610_v59, %v3799_v22  ;;  %v3917_v37 = vadd.f32 %v5584_v6, %v3800_v3 }
 0x1c8   : > { %v4574_v61 = vrot.slane %v4573_v21, 4  ;;  %v3967_v42 = vmax.f32 %v3911_v27, 0.0  ;;  %v3918_v15 = vadd.f32 %v5617_v29, %v3801_v34  ;;  %v3968_v12 = vmax.f32 %v3912_v53, 0.0 }
 0x1c9   : > { %5065 = vmatpush3.bf16.msra.mxu0 %v5109_v9  ;;  %v3969_v32 = vmax.f32 %v3913_v55, 0.0  ;;  %v3970_v48 = vmax.f32 %v3914_v41, 0.0  ;;  %v3971_v35 = vmax.f32 %v3915_v36, 0.0  ;;  %v3972_v43 = vmax.f32 %v3916_v16, 0.0  ;;  %v5112_v9 = vld [vmem:[%s6481_s4 + $0x28] sm:$0xff]   ;;  %v5113_v55 = vld [vmem:[%s6481_s4 + $0x30] sm:$0xff]  }
 0x1ca   : > { %5066 = vmatprep.subr.bf16.mxu0 %v5128_v17  ;;  %v4575_v56 = vmax.f32 %v4573_v21, %v4574_v61  ;;  %v3973_v11 = vmax.f32 %v3917_v37, 0.0  ;;  %v3974_v59 = vmax.f32 %v3918_v15, 0.0  ;;  %v4080_v6 = vadd.f32 %v6558_v50, %v3967_v42  ;;  %v5114_v16 = vld [vmem:[%s6481_s4 + $0x38] sm:$0xff]  }
 0x1cb   : > { %v4081_v10 = vadd.f32 %v5628_v31, %v3968_v12  ;;  %v4082_v18 = vadd.f32 %v6556_v62, %v3969_v32  ;;  %v4083_v8 = vadd.f32 %v6559_v7, %v3970_v48  ;;  %v4084_v29 = vadd.f32 %v5621_v60, %v3971_v35 }
 0x1cc   : > { %v4576_v28 = vrot.slane %v4575_v56, 2  ;;  %v4085_v25 = vadd.f32 %v5637_v51, %v3972_v43  ;;  %v4086_v54 = vadd.f32 %v6557_v49, %v3973_v11  ;;  %v4087_v1 = vadd.f32 %v6558_v50, %v3974_v59 }
 0x1cd   : > { %5067 = vmatpush3.bf16.msra.mxu0 %v5110_v24  ;;  %v4394_v31 = vcombine.low %v6365_v63, %v4080_v6  ;;  %v4422_v62 = vrot.slane %v4081_v10, %v5202_v14  ;;  %v4440_v2 = vcombine.low %v4082_v18, %v4083_v8  ;;  %v4572_v51 = vmax.f32 %v6243_v38, %v4571_v5 }
 0x1ce   : > { %5068 = vmatprep.subr.bf16.mxu0 %v5128_v17  ;;  %v4577_v7 = vmax.f32 %v4575_v56, %v4576_v28  ;;  %v4441_v60 = vcombine.low %v4084_v29, %v4085_v25  ;;  %v4442_v40 = vcombine.low %v4086_v54, %v4087_v1  ;;  %v4594_v49 = vsel %vm4544_vm1, %v6339_v30, -inf }
 0x1cf   : > { %v4415_v44 = vrot.slane %v4394_v31, %v5202_v14  ;;  %v4603_v50 = vpack.c.bf16 %v6383_v52, %v6383_v52  ;;  %v4449_v63 = vrot.slane %v4440_v2, %v5202_v14  ;;  %v4595_v38 = vrot.slane %v4594_v49, 4 }
 0x1d0   : > { %v4456_v13 = vrot.slane %v4441_v60, %v5202_v14  ;;  %v4578_v46 = vrot.slane %v4577_v7, 1  ;;  %v4463_v45 = vrot.slane %v4442_v40, %v5202_v14  ;;  %v4604_v30 = vpack.c.bf16 %v4572_v51, %v4572_v51 }
 0x1d1   : > { %5069 = vmatpush3.bf16.msra.mxu0 %v5111_v19  ;;  %v4424_v5 = vcombine.low %v4415_v44, %v4422_v62  ;;  %v4642_v23 = vunpack.c.l.b16 %v4603_v50  ;;  %v4596_v0 = vmax.f32 %v4594_v49, %v4595_v38  ;;  %v4649_v27 = vsel %vm4648_vm3, %v6330_v26, %v6227_v33  ;;  %v4967_v62 = vld [vmem:[%s6482_s5] ss:$0 sm:$0xff] }
 0x1d2   : > { %5070 = vmatprep.subr.bf16.mxu0 %v5128_v17  ;;  %v4471_v47 = vcombine.low %v4449_v63, %v4456_v13  ;;  %v4579_v52 = vmax.f32 %v4577_v7, %v4578_v46  ;;  %v4472_v4 = vcombine.low %v4463_v45, %v4470_v39  ;;  %v4643_v3 = vunpack.c.l.b16 %v4604_v30 }
 0x1d3   : > { %v4438_v22 = vrot.slane %v4424_v5, %v5202_v14  ;;  %v4597_v21 = vrot.slane %v4596_v0, 2  ;;  %v4651_v20 = vsel %vm4650_vm4, %v4642_v23, %v4649_v27 }
 0x1d4   : > { %v4479_v53 = vrot.slane %v4471_v47, %v5202_v14  ;;  %v4605_v58 = vpack.c.bf16 %v4579_v52, %v4579_v52  ;;  %v4486_v41 = vrot.slane %v4472_v4, %v5202_v14  ;;  %v4653_v33 = vsel %vm4652_vm5, %v4643_v3, %v4651_v20 }
 0x1d5   : > { %5071 = vmatpush3.bf16.msra.mxu0 %v5112_v9  ;;  %v4439_v34 = vcombine.low %v6388_v57, %v4438_v22  ;;  %v4598_v14 = vmax.f32 %v4596_v0, %v4597_v21 }
 0x1d6   : > { %5072 = vmatprep.subr.bf16.mxu0 %v5128_v17  ;;  %v4644_v39 = vunpack.c.l.b16 %v4605_v58  ;;  %v4487_v26 = vcombine.low %v4479_v53, %v4486_v41 }
 0x1d7   : > { %v4580_v36 = vsel %vm4544_vm1, %v4439_v34, -inf  ;;  %v4599_v32 = vrot.slane %v4598_v14, 1 }
 0x1d8   : > { %v4581_v61 = vrot.slane %v4580_v36, 4  ;;  %v4655_v37 = vsel %vm4654_vm6, %v4644_v39, %v4653_v33  ;;  %v4587_v57 = vsel %vm4544_vm1, %v4487_v26, -inf }
 0x1d9   : > { %5073 = vmatpush3.bf16.msra.mxu0 %v5113_v55  ;;  %v4588_v24 = vrot.slane %v4587_v57, 4  ;;  %v4600_v11 = vmax.f32 %v4598_v14, %v4599_v32 }
 0x1da   : > { %5074 = vmatprep.subr.bf16.mxu0 %v5128_v17  ;;  %v4582_v42 = vmax.f32 %v4580_v36, %v4581_v61 }
 0x1db   : > { %v4589_v12 = vmax.f32 %v4587_v57, %v4588_v24  ;;  %v4608_v28 = vpack.c.bf16 %v4600_v11, %v4600_v11 }
 0x1dc   : > { %v4583_v15 = vrot.slane %v4582_v42, 2 }
 0x1dd   : > { %5075 = vmatpush3.bf16.msra.mxu0 %v5114_v16  ;;  %v4590_v56 = vrot.slane %v4589_v12, 2  ;;  %v4647_v19 = vunpack.c.l.b16 %v4608_v28 }
 0x1de   : > { %v4584_v48 = vmax.f32 %v4582_v42, %v4583_v15 }
 0x1df   : > { %v4591_v43 = vmax.f32 %v4589_v12, %v4590_v56 }
 0x1e0   : > { %v4585_v35 = vrot.slane %v4584_v48, 1 }
 0x1e1   : > { %v4592_v6 = vrot.slane %v4591_v43, 1 }
 0x1e2   : > { %v4586_v59 = vmax.f32 %v4584_v48, %v4585_v35 }
 0x1e3   : > { %v4593_v10 = vmax.f32 %v4591_v43, %v4592_v6 }
 0x1e4   : > { %v4606_v18 = vpack.c.bf16 %v4586_v59, %v4586_v59 }
 0x1e5   : > { %v4607_v8 = vpack.c.bf16 %v4593_v10, %v4593_v10 }
 0x1e6   : > { %v4645_v17 = vunpack.c.l.b16 %v4606_v18 }
 0x1e7   : > { %v4646_v29 = vunpack.c.l.b16 %v4607_v8 }
 0x1e8   : > { %v4657_v25 = vsel %vm4656_vm7, %v4645_v17, %v4655_v37 }
 0x1e9   : > { %v4659_v54 = vsel %vm4658_vm8, %v4646_v29, %v4657_v25 }
 0x1ea   : > { %v4661_v1 = vsel %vm4660_vm9, %v4647_v19, %v4659_v54 }
 0x1eb   : > { %v4662_v31 = vpack.c.b16 %v4661_v1, %v4661_v1 }
 0x1ed   : > { %5077 = vmatmul.mubr.bf16.vlgmr.msra.gmra.mrb[8].mxu0 %v4662_v31 }
 0x2c0   : > { %v4746_v7 = vpop.f32.mrb[8].mxu0 }
 0x2c1   : > { %v4747_v2 = vadd.f32 %v4967_v62, %v4746_v7  ;;  %v5078_v60 = vpop.f32.mrb[9].mxu0 }
 0x2c2   : > { %v4749_v51 = vpop.f32.mrb[10].mxu0 }
 0x2c3   : > { %v5079_v44 = vpop.f32.mrb[11].mxu0  ;;  %v4753_v40 = vsel %vm4752_vm10, %v4747_v2, -inf }
 0x2c4   : > { %4754 = vmax.xlane.f32.xlu0 %v4753_v40 }
 0x351   : > { %v4755_v49 = vpop.xlane.xlu0 %4754 }
 0x352   : > { %v4756_v50 = vsub.f32 %v4747_v2, %v4755_v49 }
 0x354   : > { %v4757_v63 = vmul.f32 1.442695, %v4756_v50 }
 0x356   : > { %5115 = vpow2.f32 %v4757_v63 }
 0x360   : > { %v5116_v13 = vpop.eup %5115 }
 0x361   : > { %v4759_v9 = vsel %vm4752_vm10, %v5116_v13, 0.0 }
 0x362   : > { %4760 = vadd.xlane.f32.xlu0 %v4759_v9 }
 0x3ef   : > { %v4761_v46 = vpop.xlane.xlu0 %4760 }
 0x3f0   : > { %5117 = vlog2.f32 %v4761_v46 }
 0x3fa   : > { %v5118_v38 = vpop.eup %5117 }
 0x3fb   : > { %v4763_v5 = vmul.f32 0.6931472, %v5118_v38 }
 0x3fd   : > { %v4764_v45 = vsub.f32 %v4756_v50, %v4763_v5 }
 0x3ff   : > { %4765 = vst.msk [vmem:[%s254_s25] sm:$0xff] %vm4752_vm10, %v4764_v45 }
 0x400 PF: > { %s16_s21 = sadd.s32 1, %s5125_s21  }
 0x401   : > { %p13_p5 = scmp.ge.s32.totalorder %s16_s21, 4  }
 0x403   :  { %15 = sbr.rel (!%p13_p5) target bundleno = 1 (0x1), region = 77 }

</bundles_post_ra>
